<compile_context>
chip_gen: v7x
topology: tpu7x:2x2x1
jax: 0.10.0
libtpu: 0.0.40
codegen_flags: <defaults>
</compile_context>

<pallas_src>
import math
import jax
import jax.numpy as jnp
from jax.experimental import pallas as pl
from jax.experimental.pallas import tpu as pltpu

# ---------------- model dims (small, consistent with the module) -------------
B = 2         # batch
S = 8         # sequence length
D = 32        # input_size
H = 4         # head_count
QS = D // H   # query_size == value_size
FF = 1024     # feed-forward hidden (fixed by the module)
BS = B * S    # folded batch*seq rows
LN_EPS = 1e-5
NEG_BIG = -1e30   # "minus infinity" for the additive mask

# ---- packed weight-slab layout (lanes) ----
QKV_W = 2 * D + H * D        # 192: [Wq*s | Wk | Wvo_0..Wvo_{H-1}]
MISC_OFF = QKV_W             # 192: rows 0..5 hold bo, g1, be1, g2, be2, b2
W1_OFF = 256                 # 128-aligned offset for the 1024-wide W1 block
SLAB_W = W1_OFF + FF         # 1280 total lanes
SLAB_R = D + 8               # 40 rows (row D holds the bias row of QKV / W1)


# ----------------------------- Pallas kernel ---------------------------------
def encoder_block_kernel(x_ref, mask_ref, slab_ref, w2t_ref, out_ref):
    # x_ref:    (BS, D)         all batch rows, flattened
    # mask_ref: (BS, BS)        additive mask: block-diag batch + key padding
    # slab_ref: (D+8, SLAB_W)   [Wq*s|Wk|Wvo..] | misc vectors | W1 (row D = biases)
    # w2t_ref:  (D, FF)         W2^T, lane-dense
    x = x_ref[...]                                   # (BS, D) f32
    mask = mask_ref[...]                             # (BS, BS)

    # --- fused Q|K|V' projection (scale folded into Q, Wo folded into V) ---
    qkv = jnp.dot(x, slab_ref[:D, 0:QKV_W],
                  preferred_element_type=jnp.float32) + slab_ref[D:D + 1, 0:QKV_W]

    # --- heads: static loop; V'_h already carries Wo, so just accumulate p @ V'_h ---
    mh = jnp.zeros((BS, D), jnp.float32)
    for h in range(H):
        qh = qkv[:, h * QS:(h + 1) * QS]                       # (BS, QS) pre-scaled
        kh = qkv[:, D + h * QS:D + (h + 1) * QS]               # (BS, QS)
        vph = qkv[:, 2 * D + h * D:2 * D + (h + 1) * D]        # (BS, D)  = V_h @ Wo_h
        s = jax.lax.dot_general(qh, kh, (((1,), (1,)), ((), ())),
                                preferred_element_type=jnp.float32)   # (BS, BS)
        s = s + mask
        p = jnp.exp(s - jnp.max(s, axis=-1, keepdims=True))
        p = p * pl.reciprocal(jnp.sum(p, axis=-1, keepdims=True), approx=True)
        mh = mh + jnp.dot(p, vph, preferred_element_type=jnp.float32)  # (BS, D)

    bo_v = slab_ref[0:1, MISC_OFF:MISC_OFF + D]
    g1_v = slab_ref[1:2, MISC_OFF:MISC_OFF + D]
    be1_v = slab_ref[2:3, MISC_OFF:MISC_OFF + D]
    g2_v = slab_ref[3:4, MISC_OFF:MISC_OFF + D]
    be2_v = slab_ref[4:5, MISC_OFF:MISC_OFF + D]
    b2_v = slab_ref[5:6, MISC_OFF:MISC_OFF + D]

    attn = mh + bo_v                                 # output-projection bias

    # --- residual + LayerNorm 1 (single-pass statistics) ---
    h1 = x + attn
    m1 = jnp.mean(h1, axis=-1, keepdims=True)
    v1 = jnp.mean(h1 * h1, axis=-1, keepdims=True) - m1 * m1
    out1 = (h1 - m1) * jax.lax.rsqrt(v1 + LN_EPS) * g1_v + be1_v

    # --- feed-forward: Linear(D,1024) -> ReLU -> Linear(1024,D) -> dropout(=id) ---
    ffh = jnp.dot(out1, slab_ref[:D, W1_OFF:W1_OFF + FF],
                  preferred_element_type=jnp.float32) \
          + slab_ref[D:D + 1, W1_OFF:W1_OFF + FF]
    ffh = jnp.maximum(ffh, 0.0)
    # lane-dense W2^T: contract last dims of both operands (A @ B^T pattern)
    ff = jax.lax.dot_general(ffh, w2t_ref[...], (((1,), (1,)), ((), ())),
                             preferred_element_type=jnp.float32) + b2_v

    # --- residual + LayerNorm 2 (single-pass statistics) ---
    h2 = out1 + ff
    m2 = jnp.mean(h2, axis=-1, keepdims=True)
    v2 = jnp.mean(h2 * h2, axis=-1, keepdims=True) - m2 * m2
    out_ref[...] = (h2 - m2) * jax.lax.rsqrt(v2 + LN_EPS) * g2_v + be2_v


# --------------------------- host-side param packing -------------------------
def pack_params(params):
    """Fold QKV scale + Wo-into-V, pack everything into one slab + lane-dense W2^T."""
    (wq, bq, wk, bk, wv, bv, wo, bo, w1, b1, w2, b2, g1, be1, g2, be2) = params
    scale = jnp.float32(1.0 / math.sqrt(QS))
    # per-head folded V*Wo: Wvo_h = Wv_h @ Wo_h (D,D), bvo_h = bv_h @ Wo_h (1,D)
    wvo = [wv[:, h * QS:(h + 1) * QS] @ wo[h * QS:(h + 1) * QS, :] for h in range(H)]
    bvo = [bv[:, h * QS:(h + 1) * QS] @ wo[h * QS:(h + 1) * QS, :] for h in range(H)]
    qkv_w = jnp.concatenate([wq * scale, wk] + wvo, axis=1)      # (D, QKV_W)
    qkv_b = jnp.concatenate([bq * scale, bk] + bvo, axis=1)      # (1, QKV_W)

    slab = jnp.zeros((SLAB_R, SLAB_W), jnp.float32)
    slab = slab.at[:D, 0:QKV_W].set(qkv_w)
    slab = slab.at[D, 0:QKV_W].set(qkv_b[0])
    misc = jnp.concatenate([bo, g1, be1, g2, be2, b2], axis=0)   # (6, D)
    slab = slab.at[0:6, MISC_OFF:MISC_OFF + D].set(misc)
    slab = slab.at[:D, W1_OFF:W1_OFF + FF].set(w1)
    slab = slab.at[D, W1_OFF:W1_OFF + FF].set(b1[0])

    w2t = jnp.asarray(w2.T, jnp.float32)                         # (D, FF) lane-dense
    return slab, w2t


# ------------------------------- wrapper --------------------------------------
def encoder_block(inputs, padding_mask, packed_params):
    """inputs: (B, S, D) f32, padding_mask: (B, S) f32 (1.0 = pad)."""
    slab, w2t = packed_params
    x2 = inputs.reshape(BS, D)

    # block-diagonal batch mask + key-padding mask, additive, precomputed host-side
    batch_ids = jnp.repeat(jnp.arange(BS) // S, 1)
    same_batch = batch_ids[:, None] == batch_ids[None, :]
    key_ok = (padding_mask.reshape(-1) <= 0.5)[None, :]
    mask = jnp.where(same_batch & key_ok, 0.0, NEG_BIG).astype(jnp.float32)

    out2 = pl.pallas_call(
        encoder_block_kernel,
        out_shape=jax.ShapeDtypeStruct((BS, D), jnp.float32),
        grid_spec=pl.GridSpec(
            grid=(1,),
            in_specs=[
                pl.BlockSpec((BS, D), lambda i: (0, 0)),          # x (flattened)
                pl.BlockSpec((BS, BS), lambda i: (0, 0)),         # additive mask
                pl.BlockSpec((SLAB_R, SLAB_W), lambda i: (0, 0)),  # merged weight slab
                pl.BlockSpec((D, FF), lambda i: (0, 0)),          # W2^T (lane-dense)
            ],
            out_specs=pl.BlockSpec((BS, D), lambda i: (0, 0)),
        ),
        compiler_params=pltpu.CompilerParams(
            dimension_semantics=("arbitrary",)),
    )(x2, mask, slab, w2t)
    return out2.reshape(B, S, D), padding_mask   # module returns (out, padding_mask)


# -------------------------- pure-JAX reference --------------------------------
def encoder_block_ref(x, pm, params):
    (wq, bq, wk, bk, wv, bv, wo, bo, w1, b1, w2, b2, g1, be1, g2, be2) = params
    q = (x @ wq + bq).reshape(B, S, H, QS).transpose(0, 2, 1, 3)
    k = (x @ wk + bk).reshape(B, S, H, QS).transpose(0, 2, 1, 3)
    v = (x @ wv + bv).reshape(B, S, H, QS).transpose(0, 2, 1, 3)
    mask = jnp.where(pm > 0.5, NEG_BIG, 0.0)[:, None, None, :]      # (B,1,1,S)
    s = (jnp.einsum("bhqd,bhkd->bhqk", q, k) + mask) / math.sqrt(QS)
    p = jax.nn.softmax(s, axis=-1)
    o = jnp.einsum("bhqk,bhkd->bhqd", p, v).transpose(0, 2, 1, 3).reshape(B, S, D)
    attn = o @ wo + bo

    def ln(h, g, be):
        m = jnp.mean(h, -1, keepdims=True)
        vv = jnp.mean((h - m) ** 2, -1, keepdims=True)
        return (h - m) * jax.lax.rsqrt(vv + LN_EPS) * g + be

    out1 = ln(x + attn, g1, be1)
    ff = jnp.maximum(out1 @ w1 + b1, 0.0) @ w2 + b2
    return ln(out1 + ff, g2, be2)


# --------------------------------- main ----------------------------------------
if __name__ == "__main__":
    key = jax.random.PRNGKey(0)
    ks = jax.random.split(key, 16)

    def w(k, shape, scale=0.05):
        return (scale * jax.random.normal(k, shape)).astype(jnp.float32)

    params = (
        w(ks[0], (D, D)),  w(ks[1], (1, D)),       # wq, bq
        w(ks[2], (D, D)),  w(ks[3], (1, D)),       # wk, bk
        w(ks[4], (D, D)),  w(ks[5], (1, D)),       # wv, bv
        w(ks[6], (D, D)),  w(ks[7], (1, D)),       # wo, bo
        w(ks[8], (D, FF)), w(ks[9], (1, FF)),      # w1, b1
        w(ks[10], (FF, D)), w(ks[11], (1, D)),     # w2, b2
        jnp.ones((1, D), jnp.float32),  jnp.zeros((1, D), jnp.float32),   # LN1 gamma/beta
        jnp.ones((1, D), jnp.float32),  jnp.zeros((1, D), jnp.float32),   # LN2 gamma/beta
    )

    x = jax.random.normal(ks[12], (B, S, D), dtype=jnp.float32)
    # last two positions of each sequence are padding (1.0 = pad)
    padding_mask = jnp.zeros((B, S), jnp.float32).at[:, -2:].set(1.0)

    packed = jax.tree_util.tree_map(jax.block_until_ready, pack_params(params))

    out, pm_out = encoder_block(x, padding_mask, packed)
    out = jax.block_until_ready(out)

    ref = encoder_block_ref(x, padding_mask, params)
    assert out.shape == (B, S, D)
    # tolerance relaxed slightly: approx-reciprocal softmax + one-pass LN stats + Wvo fold
    assert jnp.allclose(out, ref, atol=2e-3, rtol=2e-3), "mismatch vs JAX reference"
    assert jnp.array_equal(pm_out, padding_mask)

    print("KERNEL_OK")
</pallas_src>

<mosaic_0001>
module attributes {stable_mosaic.version = 11 : i64} {
  func.func @encoder_block_kernel(%arg0: i32, %arg1: memref<16x32xf32, #tpu.memory_space<vmem>>, %arg2: memref<16x16xf32, #tpu.memory_space<vmem>>, %arg3: memref<40x1280xf32, #tpu.memory_space<vmem>>, %arg4: memref<32x1024xf32, #tpu.memory_space<vmem>>, %arg5: memref<16x32xf32, #tpu.memory_space<vmem>>) attributes {dimension_semantics = [#tpu.dimension_semantics<arbitrary>], iteration_bounds = array<i64: 1>, scalar_prefetch = 0 : i64, scratch_operands = 0 : i64, tpu.core_type = #tpu.core_type<tc>, window_params = [{pipeline_mode = #tpu.pipeline_mode<synchronous>, transform_indices = @transform_0, window_bounds = array<i64: 16, 32>}, {pipeline_mode = #tpu.pipeline_mode<synchronous>, transform_indices = @transform_1, window_bounds = array<i64: 16, 16>}, {pipeline_mode = #tpu.pipeline_mode<synchronous>, transform_indices = @transform_2, window_bounds = array<i64: 40, 1280>}, {pipeline_mode = #tpu.pipeline_mode<synchronous>, transform_indices = @transform_3, window_bounds = array<i64: 32, 1024>}, {pipeline_mode = #tpu.pipeline_mode<synchronous>, transform_indices = @transform_4, window_bounds = array<i64: 16, 32>}]} {
    %c0 = arith.constant 0 : index
    %c0_0 = arith.constant 0 : index
    %0 = vector.load %arg1[%c0, %c0_0] : memref<16x32xf32, #tpu.memory_space<vmem>>, vector<16x32xf32>
    %c0_1 = arith.constant 0 : index
    %c0_2 = arith.constant 0 : index
    %1 = vector.load %arg2[%c0_1, %c0_2] : memref<16x16xf32, #tpu.memory_space<vmem>>, vector<16x16xf32>
    %c0_3 = arith.constant 0 : index
    %c0_4 = arith.constant 0 : index
    %2 = vector.load %arg3[%c0_3, %c0_4] : memref<40x1280xf32, #tpu.memory_space<vmem>>, vector<32x192xf32>
    %cst = arith.constant dense<0.000000e+00> : vector<16x192xf32>
    %3 = tpu.matmul %0, %2, %cst {dimension_numbers = #tpu.dot_dimension_numbers<[1], [0], [0], [1], [0, 0, 1, 1], [], []>} : vector<16x32xf32>, vector<32x192xf32>, vector<16x192xf32> -> vector<16x192xf32>
    %c32 = arith.constant 32 : index
    %c0_5 = arith.constant 0 : index
    %4 = vector.load %arg3[%c32, %c0_5] : memref<40x1280xf32, #tpu.memory_space<vmem>>, vector<1x192xf32>
    %5 = vector.broadcast %4 : vector<1x192xf32> to vector<16x192xf32>
    %6 = arith.addf %3, %5 : vector<16x192xf32>
    %cst_6 = arith.constant 0.000000e+00 : f32
    %7 = vector.broadcast %cst_6 : f32 to vector<16x32xf32>
    %8 = vector.extract_strided_slice %6 {offsets = [0, 0], sizes = [16, 8], strides = [1, 1]} : vector<16x192xf32> to vector<16x8xf32>
    %9 = vector.extract_strided_slice %6 {offsets = [0, 32], sizes = [16, 8], strides = [1, 1]} : vector<16x192xf32> to vector<16x8xf32>
    %10 = vector.extract_strided_slice %6 {offsets = [0, 64], sizes = [16, 32], strides = [1, 1]} : vector<16x192xf32> to vector<16x32xf32>
    %cst_7 = arith.constant dense<0.000000e+00> : vector<16x16xf32>
    %11 = tpu.matmul %8, %9, %cst_7 {dimension_numbers = #tpu.dot_dimension_numbers<[1], [1], [0], [0], [0, 0, 1, 0], [], []>} : vector<16x8xf32>, vector<16x8xf32>, vector<16x16xf32> -> vector<16x16xf32>
    %12 = arith.addf %11, %1 : vector<16x16xf32>
    %cst_8 = arith.constant dense<0xFF800000> : vector<16xf32>
    %13 = vector.multi_reduction <maximumf>, %12, %cst_8 [1] : vector<16x16xf32> to vector<16xf32>
    %14 = vector.shape_cast %13 : vector<16xf32> to vector<16x1xf32>
    %15 = vector.broadcast %14 : vector<16x1xf32> to vector<16x16xf32>
    %16 = arith.subf %12, %15 : vector<16x16xf32>
    %17 = math.exp %16 : vector<16x16xf32>
    %cst_9 = arith.constant dense<0.000000e+00> : vector<16xf32>
    %18 = vector.multi_reduction <add>, %17, %cst_9 [1] : vector<16x16xf32> to vector<16xf32>
    %19 = vector.shape_cast %18 : vector<16xf32> to vector<16x1xf32>
    %20 = tpu.reciprocal %19 {approx = true} : vector<16x1xf32> -> vector<16x1xf32>
    %21 = vector.broadcast %20 : vector<16x1xf32> to vector<16x16xf32>
    %22 = arith.mulf %17, %21 : vector<16x16xf32>
    %cst_10 = arith.constant dense<0.000000e+00> : vector<16x32xf32>
    %23 = tpu.matmul %22, %10, %cst_10 {dimension_numbers = #tpu.dot_dimension_numbers<[1], [0], [0], [1], [0, 0, 1, 1], [], []>} : vector<16x16xf32>, vector<16x32xf32>, vector<16x32xf32> -> vector<16x32xf32>
    %24 = arith.addf %7, %23 : vector<16x32xf32>
    %25 = vector.extract_strided_slice %6 {offsets = [0, 8], sizes = [16, 8], strides = [1, 1]} : vector<16x192xf32> to vector<16x8xf32>
    %26 = vector.extract_strided_slice %6 {offsets = [0, 40], sizes = [16, 8], strides = [1, 1]} : vector<16x192xf32> to vector<16x8xf32>
    %27 = vector.extract_strided_slice %6 {offsets = [0, 96], sizes = [16, 32], strides = [1, 1]} : vector<16x192xf32> to vector<16x32xf32>
    %cst_11 = arith.constant dense<0.000000e+00> : vector<16x16xf32>
    %28 = tpu.matmul %25, %26, %cst_11 {dimension_numbers = #tpu.dot_dimension_numbers<[1], [1], [0], [0], [0, 0, 1, 0], [], []>} : vector<16x8xf32>, vector<16x8xf32>, vector<16x16xf32> -> vector<16x16xf32>
    %29 = arith.addf %28, %1 : vector<16x16xf32>
    %cst_12 = arith.constant dense<0xFF800000> : vector<16xf32>
    %30 = vector.multi_reduction <maximumf>, %29, %cst_12 [1] : vector<16x16xf32> to vector<16xf32>
    %31 = vector.shape_cast %30 : vector<16xf32> to vector<16x1xf32>
    %32 = vector.broadcast %31 : vector<16x1xf32> to vector<16x16xf32>
    %33 = arith.subf %29, %32 : vector<16x16xf32>
    %34 = math.exp %33 : vector<16x16xf32>
    %cst_13 = arith.constant dense<0.000000e+00> : vector<16xf32>
    %35 = vector.multi_reduction <add>, %34, %cst_13 [1] : vector<16x16xf32> to vector<16xf32>
    %36 = vector.shape_cast %35 : vector<16xf32> to vector<16x1xf32>
    %37 = tpu.reciprocal %36 {approx = true} : vector<16x1xf32> -> vector<16x1xf32>
    %38 = vector.broadcast %37 : vector<16x1xf32> to vector<16x16xf32>
    %39 = arith.mulf %34, %38 : vector<16x16xf32>
    %cst_14 = arith.constant dense<0.000000e+00> : vector<16x32xf32>
    %40 = tpu.matmul %39, %27, %cst_14 {dimension_numbers = #tpu.dot_dimension_numbers<[1], [0], [0], [1], [0, 0, 1, 1], [], []>} : vector<16x16xf32>, vector<16x32xf32>, vector<16x32xf32> -> vector<16x32xf32>
    %41 = arith.addf %24, %40 : vector<16x32xf32>
    %42 = vector.extract_strided_slice %6 {offsets = [0, 16], sizes = [16, 8], strides = [1, 1]} : vector<16x192xf32> to vector<16x8xf32>
    %43 = vector.extract_strided_slice %6 {offsets = [0, 48], sizes = [16, 8], strides = [1, 1]} : vector<16x192xf32> to vector<16x8xf32>
    %44 = vector.extract_strided_slice %6 {offsets = [0, 128], sizes = [16, 32], strides = [1, 1]} : vector<16x192xf32> to vector<16x32xf32>
    %cst_15 = arith.constant dense<0.000000e+00> : vector<16x16xf32>
    %45 = tpu.matmul %42, %43, %cst_15 {dimension_numbers = #tpu.dot_dimension_numbers<[1], [1], [0], [0], [0, 0, 1, 0], [], []>} : vector<16x8xf32>, vector<16x8xf32>, vector<16x16xf32> -> vector<16x16xf32>
    %46 = arith.addf %45, %1 : vector<16x16xf32>
    %cst_16 = arith.constant dense<0xFF800000> : vector<16xf32>
    %47 = vector.multi_reduction <maximumf>, %46, %cst_16 [1] : vector<16x16xf32> to vector<16xf32>
    %48 = vector.shape_cast %47 : vector<16xf32> to vector<16x1xf32>
    %49 = vector.broadcast %48 : vector<16x1xf32> to vector<16x16xf32>
    %50 = arith.subf %46, %49 : vector<16x16xf32>
    %51 = math.exp %50 : vector<16x16xf32>
    %cst_17 = arith.constant dense<0.000000e+00> : vector<16xf32>
    %52 = vector.multi_reduction <add>, %51, %cst_17 [1] : vector<16x16xf32> to vector<16xf32>
    %53 = vector.shape_cast %52 : vector<16xf32> to vector<16x1xf32>
    %54 = tpu.reciprocal %53 {approx = true} : vector<16x1xf32> -> vector<16x1xf32>
    %55 = vector.broadcast %54 : vector<16x1xf32> to vector<16x16xf32>
    %56 = arith.mulf %51, %55 : vector<16x16xf32>
    %cst_18 = arith.constant dense<0.000000e+00> : vector<16x32xf32>
    %57 = tpu.matmul %56, %44, %cst_18 {dimension_numbers = #tpu.dot_dimension_numbers<[1], [0], [0], [1], [0, 0, 1, 1], [], []>} : vector<16x16xf32>, vector<16x32xf32>, vector<16x32xf32> -> vector<16x32xf32>
    %58 = arith.addf %41, %57 : vector<16x32xf32>
    %59 = vector.extract_strided_slice %6 {offsets = [0, 24], sizes = [16, 8], strides = [1, 1]} : vector<16x192xf32> to vector<16x8xf32>
    %60 = vector.extract_strided_slice %6 {offsets = [0, 56], sizes = [16, 8], strides = [1, 1]} : vector<16x192xf32> to vector<16x8xf32>
    %61 = vector.extract_strided_slice %6 {offsets = [0, 160], sizes = [16, 32], strides = [1, 1]} : vector<16x192xf32> to vector<16x32xf32>
    %cst_19 = arith.constant dense<0.000000e+00> : vector<16x16xf32>
    %62 = tpu.matmul %59, %60, %cst_19 {dimension_numbers = #tpu.dot_dimension_numbers<[1], [1], [0], [0], [0, 0, 1, 0], [], []>} : vector<16x8xf32>, vector<16x8xf32>, vector<16x16xf32> -> vector<16x16xf32>
    %63 = arith.addf %62, %1 : vector<16x16xf32>
    %cst_20 = arith.constant dense<0xFF800000> : vector<16xf32>
    %64 = vector.multi_reduction <maximumf>, %63, %cst_20 [1] : vector<16x16xf32> to vector<16xf32>
    %65 = vector.shape_cast %64 : vector<16xf32> to vector<16x1xf32>
    %66 = vector.broadcast %65 : vector<16x1xf32> to vector<16x16xf32>
    %67 = arith.subf %63, %66 : vector<16x16xf32>
    %68 = math.exp %67 : vector<16x16xf32>
    %cst_21 = arith.constant dense<0.000000e+00> : vector<16xf32>
    %69 = vector.multi_reduction <add>, %68, %cst_21 [1] : vector<16x16xf32> to vector<16xf32>
    %70 = vector.shape_cast %69 : vector<16xf32> to vector<16x1xf32>
    %71 = tpu.reciprocal %70 {approx = true} : vector<16x1xf32> -> vector<16x1xf32>
    %72 = vector.broadcast %71 : vector<16x1xf32> to vector<16x16xf32>
    %73 = arith.mulf %68, %72 : vector<16x16xf32>
    %cst_22 = arith.constant dense<0.000000e+00> : vector<16x32xf32>
    %74 = tpu.matmul %73, %61, %cst_22 {dimension_numbers = #tpu.dot_dimension_numbers<[1], [0], [0], [1], [0, 0, 1, 1], [], []>} : vector<16x16xf32>, vector<16x32xf32>, vector<16x32xf32> -> vector<16x32xf32>
    %75 = arith.addf %58, %74 : vector<16x32xf32>
    %c0_23 = arith.constant 0 : index
    %c192 = arith.constant 192 : index
    %76 = vector.load %arg3[%c0_23, %c192] : memref<40x1280xf32, #tpu.memory_space<vmem>>, vector<1x32xf32>
    %c1 = arith.constant 1 : index
    %c192_24 = arith.constant 192 : index
    %77 = vector.load %arg3[%c1, %c192_24] : memref<40x1280xf32, #tpu.memory_space<vmem>>, vector<1x32xf32>
    %c2 = arith.constant 2 : index
    %c192_25 = arith.constant 192 : index
    %78 = vector.load %arg3[%c2, %c192_25] : memref<40x1280xf32, #tpu.memory_space<vmem>>, vector<1x32xf32>
    %c3 = arith.constant 3 : index
    %c192_26 = arith.constant 192 : index
    %79 = vector.load %arg3[%c3, %c192_26] : memref<40x1280xf32, #tpu.memory_space<vmem>>, vector<1x32xf32>
    %c4 = arith.constant 4 : index
    %c192_27 = arith.constant 192 : index
    %80 = vector.load %arg3[%c4, %c192_27] : memref<40x1280xf32, #tpu.memory_space<vmem>>, vector<1x32xf32>
    %c5 = arith.constant 5 : index
    %c192_28 = arith.constant 192 : index
    %81 = vector.load %arg3[%c5, %c192_28] : memref<40x1280xf32, #tpu.memory_space<vmem>>, vector<1x32xf32>
    %82 = vector.broadcast %76 : vector<1x32xf32> to vector<16x32xf32>
    %83 = arith.addf %75, %82 : vector<16x32xf32>
    %84 = arith.addf %0, %83 : vector<16x32xf32>
    %cst_29 = arith.constant dense<0.000000e+00> : vector<16xf32>
    %85 = vector.multi_reduction <add>, %84, %cst_29 [1] : vector<16x32xf32> to vector<16xf32>
    %86 = vector.shape_cast %85 : vector<16xf32> to vector<16x1xf32>
    %cst_30 = arith.constant 3.200000e+01 : f32
    %87 = vector.broadcast %cst_30 : f32 to vector<16x1xf32>
    %88 = arith.divf %86, %87 : vector<16x1xf32>
    %89 = arith.mulf %84, %84 : vector<16x32xf32>
    %cst_31 = arith.constant dense<0.000000e+00> : vector<16xf32>
    %90 = vector.multi_reduction <add>, %89, %cst_31 [1] : vector<16x32xf32> to vector<16xf32>
    %91 = vector.shape_cast %90 : vector<16xf32> to vector<16x1xf32>
    %cst_32 = arith.constant 3.200000e+01 : f32
    %92 = vector.broadcast %cst_32 : f32 to vector<16x1xf32>
    %93 = arith.divf %91, %92 : vector<16x1xf32>
    %94 = arith.mulf %88, %88 : vector<16x1xf32>
    %95 = arith.subf %93, %94 : vector<16x1xf32>
    %96 = vector.broadcast %88 : vector<16x1xf32> to vector<16x32xf32>
    %97 = arith.subf %84, %96 : vector<16x32xf32>
    %cst_33 = arith.constant 9.99999974E-6 : f32
    %98 = vector.broadcast %cst_33 : f32 to vector<16x1xf32>
    %99 = arith.addf %95, %98 : vector<16x1xf32>
    %100 = math.rsqrt %99 : vector<16x1xf32>
    %101 = vector.broadcast %100 : vector<16x1xf32> to vector<16x32xf32>
    %102 = arith.mulf %97, %101 : vector<16x32xf32>
    %103 = vector.broadcast %77 : vector<1x32xf32> to vector<16x32xf32>
    %104 = arith.mulf %102, %103 : vector<16x32xf32>
    %105 = vector.broadcast %78 : vector<1x32xf32> to vector<16x32xf32>
    %106 = arith.addf %104, %105 : vector<16x32xf32>
    %c0_34 = arith.constant 0 : index
    %c256 = arith.constant 256 : index
    %107 = vector.load %arg3[%c0_34, %c256] : memref<40x1280xf32, #tpu.memory_space<vmem>>, vector<32x1024xf32>
    %cst_35 = arith.constant dense<0.000000e+00> : vector<16x1024xf32>
    %108 = tpu.matmul %106, %107, %cst_35 {dimension_numbers = #tpu.dot_dimension_numbers<[1], [0], [0], [1], [0, 0, 1, 1], [], []>} : vector<16x32xf32>, vector<32x1024xf32>, vector<16x1024xf32> -> vector<16x1024xf32>
    %c32_36 = arith.constant 32 : index
    %c256_37 = arith.constant 256 : index
    %109 = vector.load %arg3[%c32_36, %c256_37] : memref<40x1280xf32, #tpu.memory_space<vmem>>, vector<1x1024xf32>
    %110 = vector.broadcast %109 : vector<1x1024xf32> to vector<16x1024xf32>
    %111 = arith.addf %108, %110 : vector<16x1024xf32>
    %cst_38 = arith.constant 0.000000e+00 : f32
    %112 = vector.broadcast %cst_38 : f32 to vector<16x1024xf32>
    %113 = arith.maximumf %111, %112 : vector<16x1024xf32>
    %c0_39 = arith.constant 0 : index
    %c0_40 = arith.constant 0 : index
    %114 = vector.load %arg4[%c0_39, %c0_40] : memref<32x1024xf32, #tpu.memory_space<vmem>>, vector<32x1024xf32>
    %cst_41 = arith.constant dense<0.000000e+00> : vector<16x32xf32>
    %115 = tpu.matmul %113, %114, %cst_41 {dimension_numbers = #tpu.dot_dimension_numbers<[1], [1], [0], [0], [0, 0, 1, 0], [], []>} : vector<16x1024xf32>, vector<32x1024xf32>, vector<16x32xf32> -> vector<16x32xf32>
    %116 = vector.broadcast %81 : vector<1x32xf32> to vector<16x32xf32>
    %117 = arith.addf %115, %116 : vector<16x32xf32>
    %118 = arith.addf %106, %117 : vector<16x32xf32>
    %cst_42 = arith.constant dense<0.000000e+00> : vector<16xf32>
    %119 = vector.multi_reduction <add>, %118, %cst_42 [1] : vector<16x32xf32> to vector<16xf32>
    %120 = vector.shape_cast %119 : vector<16xf32> to vector<16x1xf32>
    %cst_43 = arith.constant 3.200000e+01 : f32
    %121 = vector.broadcast %cst_43 : f32 to vector<16x1xf32>
    %122 = arith.divf %120, %121 : vector<16x1xf32>
    %123 = arith.mulf %118, %118 : vector<16x32xf32>
    %cst_44 = arith.constant dense<0.000000e+00> : vector<16xf32>
    %124 = vector.multi_reduction <add>, %123, %cst_44 [1] : vector<16x32xf32> to vector<16xf32>
    %125 = vector.shape_cast %124 : vector<16xf32> to vector<16x1xf32>
    %cst_45 = arith.constant 3.200000e+01 : f32
    %126 = vector.broadcast %cst_45 : f32 to vector<16x1xf32>
    %127 = arith.divf %125, %126 : vector<16x1xf32>
    %128 = arith.mulf %122, %122 : vector<16x1xf32>
    %129 = arith.subf %127, %128 : vector<16x1xf32>
    %130 = vector.broadcast %122 : vector<16x1xf32> to vector<16x32xf32>
    %131 = arith.subf %118, %130 : vector<16x32xf32>
    %cst_46 = arith.constant 9.99999974E-6 : f32
    %132 = vector.broadcast %cst_46 : f32 to vector<16x1xf32>
    %133 = arith.addf %129, %132 : vector<16x1xf32>
    %134 = math.rsqrt %133 : vector<16x1xf32>
    %135 = vector.broadcast %134 : vector<16x1xf32> to vector<16x32xf32>
    %136 = arith.mulf %131, %135 : vector<16x32xf32>
    %137 = vector.broadcast %79 : vector<1x32xf32> to vector<16x32xf32>
    %138 = arith.mulf %136, %137 : vector<16x32xf32>
    %139 = vector.broadcast %80 : vector<1x32xf32> to vector<16x32xf32>
    %140 = arith.addf %138, %139 : vector<16x32xf32>
    %c0_47 = arith.constant 0 : index
    %c0_48 = arith.constant 0 : index
    %141 = vector.load %arg5[%c0_47, %c0_48] : memref<16x32xf32, #tpu.memory_space<vmem>>, vector<16x32xf32>
    tpu.vector_store %arg5[%c0_47, %c0_48], %140 {strides = array<i32>} : memref<16x32xf32, #tpu.memory_space<vmem>>, vector<16x32xf32>,
    return
  }
  func.func @transform_0(%arg0: i32) -> (i32, i32) {
    %c0_i32 = arith.constant 0 : i32
    %c0_i32_0 = arith.constant 0 : i32
    %c0_i32_1 = arith.constant 0 : i32
    return %c0_i32, %c0_i32_0 : i32, i32
  }
  func.func @transform_1(%arg0: i32) -> (i32, i32) {
    %c0_i32 = arith.constant 0 : i32
    %c0_i32_0 = arith.constant 0 : i32
    %c0_i32_1 = arith.constant 0 : i32
    return %c0_i32, %c0_i32_0 : i32, i32
  }
  func.func @transform_2(%arg0: i32) -> (i32, i32) {
    %c0_i32 = arith.constant 0 : i32
    %c0_i32_0 = arith.constant 0 : i32
    %c0_i32_1 = arith.constant 0 : i32
    return %c0_i32, %c0_i32_0 : i32, i32
  }
  func.func @transform_3(%arg0: i32) -> (i32, i32) {
    %c0_i32 = arith.constant 0 : i32
    %c0_i32_0 = arith.constant 0 : i32
    %c0_i32_1 = arith.constant 0 : i32
    return %c0_i32, %c0_i32_0 : i32, i32
  }
  func.func @transform_4(%arg0: i32) -> (i32, i32) {
    %c0_i32 = arith.constant 0 : i32
    %c0_i32_0 = arith.constant 0 : i32
    %c0_i32_1 = arith.constant 0 : i32
    return %c0_i32, %c0_i32_0 : i32, i32
  }
}

</mosaic_0001>

<bundles_post_ra>
// kernel: tpu_custom_call.1
= control target key start
LH: loop header
LB: loop body
LE: loop exit
PB: predicated region body
PF: predicated region fallthrough
CT: control target
= control target key end

     0   :  { %9 = vsyncpa [#allocation3], 0  ;;  %s2636_s0 = inlined_call_operand.hbm [shape: f32[16,32], index: 0, kind: input, shape index: {}]   ;;  %s2637_s1 = inlined_call_operand.hbm [shape: f32[16,16], index: 1, kind: input, shape index: {}]   ;;  %s2638_s2 = inlined_call_operand.hbm [shape: f32[40,1280], index: 2, kind: input, shape index: {}]   ;;  %s2639_s3 = inlined_call_operand.hbm [shape: f32[32,1024], index: 3, kind: input, shape index: {}]   ;;  %s2640_s4 = inlined_call_operand.hbm [shape: f32[16,32], index: 4, kind: output, shape index: {}]  }
   0x1   :  { %10 = vsyncpa [#allocation6], 0 }
   0x2   :  { %11 = vsyncpa [#allocation9], 0 }
   0x3   :  { %12 = vsyncpa [#allocation4], 0  ;;  %s2299_s15 = smov [#allocation5]   ;;  %s2300_s17 = smov [#allocation2]  }
   0x4   :  { %s30_s16 = sshll.u32 %s2299_s15, 4  ;;  %s18_s18 = sshll.u32 %s2300_s17, 4  ;;  %s31_s16 = int_to_ptr.vmem [resolvable:$true] %s30_s16  ;;  %s2343_s18 = int_to_ptr.vmem [resolvable:$true] %s18_s18 }
   0x5   :  { %s2181_s21 = scalar_lea.hbm %s2637_s1, 256 }
   0x6   :  { %p2182_p0 = scmp.ne.s32.totalorder %s2637_s1, %s2181_s21  ;;  %p2185_p1 = scmp.lt.u32.totalorder %s2181_s21, %s2637_s1 }
   0x8   :  { %p2187_p2 = pnand %p2185_p1, %p2182_p0 }
   0xa   :  { %2190 = shalt.err (!%p2187_p2)
}
   0xb   :  { %s2191_s26 = scalar_lea.vmem %s31_s16, 256  ;;  %p2196_p4 = scmp.lt.s32.totalorder %s31_s16, %s31_s16 }
   0xc   :  { %p2192_p3 = scmp.ne.s32.totalorder %s31_s16, %s2191_s26  ;;  %p2197_p5 = scmp.lt.s32.totalorder %s2191_s26, %s2191_s26 }
   0xe   :  { %p2198_p6 = por %p2197_p5, %p2196_p4 }
  0x10   :  { %p2199_p7 = pnand %p2198_p6, %p2192_p3 }
  0x12   :  { %2202 = shalt.err (!%p2199_p7)
}
  0x13   :  { %s2301_s27 = smov 128   ;;  %s2302_s28 = smov 8  }
  0x14   :  { %36 = dma.hbm_to_vmem [thread:$0]  %s2637_s1, 256, %s31_s16, [#allocation6], %s2301_s27, %s2301_s27, %s2302_s28  }
  0x15   :  { %s2203_s7 = scalar_lea.hbm %s2636_s0, 256 }
  0x16   :  { %p2204_p8 = scmp.ne.s32.totalorder %s2636_s0, %s2203_s7  ;;  %p2207_p9 = scmp.lt.u32.totalorder %s2203_s7, %s2636_s0 }
  0x18   :  { %p2209_p10 = pnand %p2207_p9, %p2204_p8 }
  0x1a   :  { %2212 = shalt.err (!%p2209_p10)
}
  0x1b   :  { %s2213_s12 = scalar_lea.vmem %s2343_s18, 256  ;;  %p2218_p12 = scmp.lt.s32.totalorder %s2343_s18, %s2343_s18 }
  0x1c   :  { %p2214_p11 = scmp.ne.s32.totalorder %s2343_s18, %s2213_s12  ;;  %p2219_p13 = scmp.lt.s32.totalorder %s2213_s12, %s2213_s12 }
  0x1e   :  { %p2220_p0 = por %p2219_p13, %p2218_p12 }
  0x20   :  { %p2221_p1 = pnand %p2220_p0, %p2214_p11 }
  0x22   :  { %2224 = shalt.err (!%p2221_p1)
}
  0x23   :  { %24 = dma.hbm_to_vmem [thread:$0]  %s2636_s0, 256, %s2343_s18, [#allocation3], %s2301_s27, %s2301_s27, %s2302_s28  }
  0x24   :  { %s2303_s14 = smov [#allocation7]   ;;  %s2225_s19 = scalar_lea.hbm %s2638_s2, 6400 }
  0x25   :  { %s42_s15 = sshll.u32 %s2303_s14, 4  ;;  %p2226_p2 = scmp.ne.s32.totalorder %s2638_s2, %s2225_s19  ;;  %s43_s15 = int_to_ptr.vmem [resolvable:$true] %s42_s15 }
  0x26   :  { %p2229_p3 = scmp.lt.u32.totalorder %s2225_s19, %s2638_s2 }
  0x28   :  { %p2231_p4 = pnand %p2229_p3, %p2226_p2 }
  0x2a   :  { %2234 = shalt.err (!%p2231_p4)
}
  0x2b   :  { %s2235_s24 = scalar_lea.vmem %s43_s15, 6400  ;;  %p2240_p6 = scmp.lt.s32.totalorder %s43_s15, %s43_s15 }
  0x2c   :  { %p2236_p5 = scmp.ne.s32.totalorder %s43_s15, %s2235_s24  ;;  %p2241_p7 = scmp.lt.s32.totalorder %s2235_s24, %s2235_s24 }
  0x2e   :  { %p2242_p8 = por %p2241_p7, %p2240_p6 }
  0x30   :  { %p2243_p9 = pnand %p2242_p8, %p2236_p5 }
  0x32   :  { %2246 = shalt.err (!%p2243_p9)
}
  0x33   :  { %s2304_s0 = smov 1280   ;;  %s2305_s18 = smov 80  }
  0x34   :  { %48 = dma.hbm_to_vmem [thread:$0]  %s2638_s2, 6400, %s43_s15, [#allocation6], %s2304_s0, %s2304_s0, %s2305_s18  }
  0x35   :  { %s2306_s29 = smov [#allocation8]   ;;  %s2247_s7 = scalar_lea.hbm %s2639_s3, 4096 }
  0x36   :  { %s54_s30 = sshll.u32 %s2306_s29, 4  ;;  %p2248_p10 = scmp.ne.s32.totalorder %s2639_s3, %s2247_s7  ;;  %s55_s30 = int_to_ptr.vmem [resolvable:$true] %s54_s30 }
  0x37   :  { %p2251_p11 = scmp.lt.u32.totalorder %s2247_s7, %s2639_s3 }
  0x39   :  { %p2253_p12 = pnand %p2251_p11, %p2248_p10 }
  0x3b   :  { %2256 = shalt.err (!%p2253_p12)
}
  0x3c   :  { %s2257_s12 = scalar_lea.vmem %s55_s30, 4096  ;;  %p2262_p0 = scmp.lt.s32.totalorder %s55_s30, %s55_s30 }
  0x3d   :  { %p2258_p13 = scmp.ne.s32.totalorder %s55_s30, %s2257_s12  ;;  %p2263_p1 = scmp.lt.s32.totalorder %s2257_s12, %s2257_s12 }
  0x3f   :  { %p2264_p2 = por %p2263_p1, %p2262_p0 }
  0x41   :  { %p2265_p3 = pnand %p2264_p2, %p2258_p13 }
  0x43   :  { %2268 = shalt.err (!%p2265_p3)
}
  0x44   :  { %s2307_s2 = smov 1024   ;;  %s2308_s1 = smov 64  }
  0x45   :  { %60 = dma.hbm_to_vmem [thread:$0]  %s2639_s3, 4096, %s55_s30, [#allocation9], %s2307_s2, %s2307_s2, %s2308_s1  }
  0x46   :  { %2291 = dma.done.wait [#allocation3], 256  }
  0x47   :  { %2292 = vsyncadd [#allocation3], 4294967040 }
  0x48   :  { %2293 = dma.done.wait [#allocation6], 6656  }
  0x49   :  { %2294 = vsyncadd [#allocation6], 4294960640 }
  0x4a   :  { %2295 = dma.done.wait [#allocation9], 4096  }
  0x4b   :  { %2296 = vsyncadd [#allocation9], 4294963200  ;;  %v2309_v0 = vmov 0.0   ;;  %v78_v1 = vld [vmem:[#allocation7 + $0x8] sm:$0xff]  ;;  %v80_v2 = vld [vmem:[#allocation7 + $0x58] sm:$0xff]  ;;  %vm98_vm0 = vcmask 261120   ;;  %v88_v15 = vlaneseq }
  0x4c   :  { %169 = vmatprep.mubr.f32.mxu0 %v2309_v0  ;;  %v77_v3 = vld [vmem:[#allocation7] sm:$0xff]  ;;  %v1969_v4 = vpack.c.bf16 %v80_v2, %v78_v1  ;;  %v79_v5 = vld [vmem:[#allocation7 + $0x50] sm:$0xff]  ;;  %v82_v6 = vld [vmem:[#allocation7 + $0xa8] sm:$0xff]  ;;  %vm188_vm1 = vcmask 64512   ;;  %s2310_s3 = smov 120   ;;  %s2311_s15 = smov 88  }
  0x4d   :  { %v84_v7 = vld [vmem:[#allocation7 + $0xf8] sm:$0xff]  ;;  %v1971_v8 = vpack.c.bf16 %v79_v5, %v77_v3  ;;  %v81_v10 = vld [vmem:[#allocation7 + $0xa0] sm:$0xff]  ;;  %v83_v11 = vld [vmem:[#allocation7 + $0xf0] sm:$0xff]  ;;  %v2416_v16 = vshrl.u32 %v88_v15, 7  ;;  %s2312_s16 = smov 112   ;;  %s2313_s17 = smov 96  }
  0x4e   :  { %v1973_v9 = vpack.c.bf16 %v84_v7, %v82_v6  ;;  %1970 = vmatprep.subr.bf16.mxu0 %v1969_v4  ;;  %v1975_v12 = vpack.c.bf16 %v83_v11, %v81_v10  ;;  %v2407_v13 = vld [vmem:[#allocation2] sm:$0xff]  ;;  %v2412_v14 = vld [vmem:[#allocation2 + $0x8] sm:$0xff]  ;;  %vm2456_vm2 = vmpackc.low %vm188_vm1, %vm188_vm1  ;;  %vm272_vm3 = vcmask 130048   ;;  %s2314_s19 = smov 72   ;;  %s2315_s20 = smov 32  }
  0x4f   :  { %1972 = vmatpush1.bf16.msra.mxu0 %v1971_v8  ;;  %v90_v17 = vsub.s32 0, %v2416_v16  ;;  %v86_v18 = vld [vmem:[#allocation7 + $0x140] ss:$8 sm:$0x3]  ;;  %v94_v20 = vsub.s32 1, %v2416_v16  ;;  %v2478_v50 = vld [vmem:[#allocation5 + $0x8] sm:$0xff] }
  0x50   :  { %1974 = vmatprep.subr.bf16.mxu0 %v1973_v9  ;;  %v2480_v51 = vld [vmem:[#allocation5] sm:$0xff]  ;;  %s2316_s21 = smov 104   ;;  %s2317_s22 = smov [#allocation10]  }
  0x51   :  { %v91_v19 = vrot.slane %v86_v18, %v90_v17  ;;  %v95_v24 = vrot.slane %v86_v18, %v94_v20  ;;  %s1833_s23 = sshll.u32 %s2317_s22, 4  ;;  %s1834_s23 = int_to_ptr.vmem [resolvable:$true] %s1833_s23 }
  0x52   :  { %s2269_s24 = scalar_lea.vmem %s1834_s23, 256  ;;  %p2274_p5 = scmp.lt.s32.totalorder %s1834_s23, %s1834_s23 }
  0x53   :  { %1976 = vmatpush1.bf16.msra.mxu0 %v1975_v12  ;;  %p2270_p4 = scmp.ne.s32.totalorder %s1834_s23, %s2269_s24  ;;  %p2275_p6 = scmp.lt.s32.totalorder %s2269_s24, %s2269_s24 }
  0x55   :  { %p2276_p7 = por %p2275_p6, %p2274_p5 }
  0x56   :  { %1847 = vmatmul.mubr.msk.f32.vlgmr.msra.gmra.mrb[0].mxu0 %vm98_vm0, %v2407_v13 }
  0x57   :  { %175 = vmatprep.mubr.f32.mxu0 %v2309_v0  ;;  %p2277_p8 = pnand %p2276_p7, %p2270_p4 }
  0x5a   :  { %1848 = vmatmul.mubr.msk.f32.gmra.mrb[2].mxu0 %vm98_vm0, %v2412_v14 }
 0x129   :  { %v171_v21 = vpop.f32.mrb[0].mxu0 }
 0x12a   :  { %v2422_v22 = vadd.f32 %v171_v21, %v91_v19  ;;  %v173_v23 = vpop.f32.mrb[1].mxu0 }
 0x12b   :  { %v2431_v28 = vadd.f32 %v173_v23, %v95_v24 }
 0x12c   :  { %295 = vrot.lane.b32.xlu1 %v2422_v22, %s2310_s3  ;;  %1917 = vmatprep.mubr.msk.f32.mxu1 %vm188_vm1, %v2422_v22 }
 0x12d   :  { %v177_v25 = vpop.f32.mrb[2].mxu0 }
 0x12e   :  { %v2429_v26 = vadd.f32 %v177_v25, %v91_v19  ;;  %v179_v27 = vpop.f32.mrb[3].mxu0 }
 0x12f   :  { %v2433_v29 = vadd.f32 %v179_v27, %v95_v24 }
 0x130   :  { %297 = vrot.lane.b32.xlu1 %v2429_v26, %s2310_s3  ;;  %v2438_v30 = vpack.i.bf16 %v2429_v26, %v2422_v22 }
 0x131   :  { %v2136_v31 = vpack.i.bf16 %v2433_v29, %v2431_v28  ;;  %v2444_v32 = vpack.c.bf16 %v2433_v29, %v2431_v28  ;;  %v982_v29 = vld [vmem:[#allocation7 + $0x8] ss:$0 sm:$0xff] }
 0x132   :  { %2107 = vrot.lane.b32.xlu0 %v2438_v30, %s2311_s15 }
 0x134   :  { %582 = vrot.lane.b32.xlu1 %v2422_v22, %s2312_s16 }
 0x136   :  { %2112 = vrot.lane.b32.xlu0 %v2438_v30, %s2313_s17 }
 0x13a   :  { %2117 = vrot.lane.b32.xlu0 %v2438_v30, %s2305_s18 }
 0x13e   :  { %584 = vrot.lane.b32.xlu0 %v2429_v26, %s2312_s16 }
 0x19e   :  { %v296_v33 = vpop.permute.xlu1 %295 }
 0x19f   :  { %1924 = vmatprep.mubr.msk.f32.mxu0 %vm188_vm1, %v296_v33 }
 0x1a2   :  { %v298_v42 = vpop.permute.xlu1 %297 }
 0x1a4   :  { %v2108_v34 = vpop.permute.xlu0 %2107 }
 0x1a5   :  { %v2110_v35 = vunpack.i.h.bf16 %v2108_v34  ;;  %v2109_v36 = vunpack.i.l.bf16 %v2108_v34 }
 0x1a6   :  { %v583_v48 = vpop.permute.xlu1 %582 }
 0x1a7   :  { %v1983_v38 = vpack.c.bf16 %v2110_v35, %v2109_v36 }
 0x1a8   :  { %v2113_v39 = vpop.permute.xlu0 %2112 }
 0x1a9   :  { %v2115_v40 = vunpack.i.h.bf16 %v2113_v39  ;;  %v2114_v41 = vunpack.i.l.bf16 %v2113_v39  ;;  %1985 = vmatprep.subr.msk.bf16.mxu0 %vm2456_vm2, %v1983_v38 }
 0x1aa   :  { %1988 = vmatpush3.bf16.xpose.msk.msra.mxu0 %vm2456_vm2, %v1983_v38 }
 0x1ab   :  { %v1977_v43 = vpack.c.bf16 %v2115_v40, %v2114_v41 }
 0x1ac   :  { %v2118_v44 = vpop.permute.xlu0 %2117 }
 0x1ad   :  { %v2120_v45 = vunpack.i.h.bf16 %v2118_v44  ;;  %v2119_v46 = vunpack.i.l.bf16 %v2118_v44  ;;  %1979 = vmatprep.subr.msk.bf16.mxu1 %vm2456_vm2, %v1977_v43 }
 0x1ae   :  { %1982 = vmatpush3.bf16.xpose.msk.msra.mxu1 %vm2456_vm2, %v1977_v43 }
 0x1af   :  { %v1997_v47 = vpack.c.bf16 %v2120_v45, %v2119_v46 }
 0x1b0   :  { %v585_v49 = vpop.permute.xlu0 %584 }
 0x1b1   :  { %1925 = vmatmul.mubr.msk.f32.vlgmr.msra.gmra.mrb[4].mxu0 %vm188_vm1, %v298_v42  ;;  %1999 = vmatprep.subr.msk.bf16.mxu0 %vm2456_vm2, %v1997_v47 }
 0x1b2   :  { %2002 = vmatpush3.bf16.xpose.msk.msra.mxu0 %vm2456_vm2, %v1997_v47  ;;  %1945 = vmatprep.mubr.msk.f32.mxu0 %vm188_vm1, %v583_v48 }
 0x1b5   :  { %1918 = vmatmul.mubr.msk.f32.vlgmr.msra.gmra.mrb[0].mxu1 %vm188_vm1, %v2429_v26 }
 0x1b9   :  { %1946 = vmatmul.mubr.msk.f32.vlgmr.msra.gmra.mrb[6].mxu0 %vm188_vm1, %v585_v49 }
 0x1ba   :  { %1186 = vmatprep.mubr.f32.mxu0 %v2309_v0 }
 0x284   :  { %v1926_v52 = vpop.f32.mrb[4].mxu0 }
 0x285   :  { %v383_v53 = vadd.f32 %v1926_v52, %v2478_v50  ;;  %v377_v54 = vpop.f32.mrb[5].mxu0 }
 0x286   :  { %v378_v55 = vadd.f32 %v377_v54, %v2480_v51 }
 0x287   :  { %v389_v56 = vsel %vm272_vm3, %v383_v53, -inf }
 0x288   :  { %390 = vmax.xlane.f32.xlu0 %v389_v56  ;;  %v1919_v57 = vpop.f32.mrb[0].mxu1  ;;  %v386_v58 = vsel %vm272_vm3, %v378_v55, -inf }
 0x289   :  { %v269_v59 = vadd.f32 %v1919_v57, %v2478_v50  ;;  %387 = vmax.xlane.f32.xlu1 %v386_v58  ;;  %v263_v60 = vpop.f32.mrb[1].mxu1 }
 0x28a   :  { %v264_v61 = vadd.f32 %v263_v60, %v2480_v51 }
 0x28b   :  { %v276_v62 = vsel %vm272_vm3, %v269_v59, -inf }
 0x28c   :  { %v1947_v63 = vpop.f32.mrb[6].mxu0  ;;  %v273_v1 = vsel %vm272_vm3, %v264_v61, -inf }
 0x28d   :  { %v670_v2 = vadd.f32 %v1947_v63, %v2478_v50  ;;  %v664_v3 = vpop.f32.mrb[7].mxu0  ;;  %277 = vmax.xlane.f32.xlu1 %v276_v62  ;;  %274 = vmax.xlane.f32.xlu0 %v273_v1 }
 0x28e   :  { %v665_v4 = vadd.f32 %v664_v3, %v2480_v51 }
 0x28f   :  { %v676_v5 = vsel %vm272_vm3, %v670_v2, -inf }
 0x290   :  { %v673_v6 = vsel %vm272_vm3, %v665_v4, -inf }
 0x291   :  { %677 = vmax.xlane.f32.xlu1 %v676_v5  ;;  %674 = vmax.xlane.f32.xlu0 %v673_v6 }
 0x315   :  { %v391_v7 = vpop.xlane.xlu0 %390 }
 0x316   :  { %v393_v8 = vsub.f32 %v383_v53, %v391_v7  ;;  %v388_v9 = vpop.xlane.xlu1 %387 }
 0x317   :  { %v392_v10 = vsub.f32 %v378_v55, %v388_v9 }
 0x318   :  { %v396_v11 = vmul.f32 1.442695, %v393_v8 }
 0x319   :  { %v394_v12 = vmul.f32 1.442695, %v392_v10 }
 0x31a   :  { %2141 = vpow2.f32 %v396_v11  ;;  %v278_v15 = vpop.xlane.xlu1 %277  ;;  %v275_v18 = vpop.xlane.xlu0 %274 }
 0x31b   :  { %2143 = vpow2.f32 %v394_v12  ;;  %v280_v19 = vsub.f32 %v269_v59, %v278_v15  ;;  %v279_v21 = vsub.f32 %v264_v61, %v275_v18 }
 0x31d   :  { %v283_v23 = vmul.f32 1.442695, %v280_v19  ;;  %v281_v24 = vmul.f32 1.442695, %v279_v21 }
 0x31e   :  { %v678_v25 = vpop.xlane.xlu1 %677  ;;  %v675_v27 = vpop.xlane.xlu0 %674 }
 0x31f   :  { %2145 = vpow2.f32 %v283_v23  ;;  %v680_v33 = vsub.f32 %v670_v2, %v678_v25  ;;  %v679_v34 = vsub.f32 %v665_v4, %v675_v27 }
 0x320   :  { %2147 = vpow2.f32 %v281_v24 }
 0x321   :  { %v683_v35 = vmul.f32 1.442695, %v680_v33  ;;  %v681_v36 = vmul.f32 1.442695, %v679_v34 }
 0x323   :  { %2149 = vpow2.f32 %v683_v35 }
 0x324   :  { %v2142_v38 = vpop.eup %2141  ;;  %2151 = vpow2.f32 %v681_v36 }
 0x325   :  { %v2144_v39 = vpop.eup %2143  ;;  %v401_v40 = vsel %vm272_vm3, %v2142_v38, 0.0 }
 0x326   :  { %402 = vadd.xlane.f32.xlu1 %v401_v40  ;;  %v398_v41 = vsel %vm272_vm3, %v2144_v39, 0.0 }
 0x327   :  { %399 = vadd.xlane.f32.xlu0 %v398_v41 }
 0x329   :  { %v2146_v42 = vpop.eup %2145 }
 0x32a   :  { %v2148_v43 = vpop.eup %2147  ;;  %v288_v44 = vsel %vm272_vm3, %v2146_v42, 0.0 }
 0x32b   :  { %289 = vadd.xlane.f32.xlu1 %v288_v44  ;;  %v285_v45 = vsel %vm272_vm3, %v2148_v43, 0.0 }
 0x32c   :  { %286 = vadd.xlane.f32.xlu0 %v285_v45 }
 0x32d   :  { %v2150_v46 = vpop.eup %2149 }
 0x32e   :  { %v2152_v47 = vpop.eup %2151  ;;  %v688_v48 = vsel %vm272_vm3, %v2150_v46, 0.0 }
 0x32f   :  { %689 = vadd.xlane.f32.xlu1 %v688_v48  ;;  %v685_v49 = vsel %vm272_vm3, %v2152_v47, 0.0 }
 0x330   :  { %686 = vadd.xlane.f32.xlu0 %v685_v49 }
 0x340   :  { %2127 = vrot.lane.b32.xlu1 %v2438_v30, %s2308_s1 }
 0x344   :  { %2132 = vrot.lane.b32.xlu1 %v2438_v30, %s2314_s19 }
 0x346   :  { %2122 = vrot.lane.b32.xlu0 %v2438_v30, %s2315_s20 }
 0x348   :  { %780 = vrot.lane.b32.xlu1 %v2429_v26, %s2316_s21 }
 0x34a   :  { %778 = vrot.lane.b32.xlu0 %v2422_v22, %s2316_s21 }
 0x3b3   :  { %v403_v52 = vpop.xlane.xlu1 %402 }
 0x3b4   :  { %v400_v53 = vpop.xlane.xlu0 %399 }
 0x3b5   :  { %2153 = vrcp.f32 %v400_v53 }
 0x3b6   :  { %2155 = vrcp.f32 %v403_v52 }
 0x3b8   :  { %v290_v54 = vpop.xlane.xlu1 %289 }
 0x3b9   :  { %v287_v55 = vpop.xlane.xlu0 %286 }
 0x3ba   :  { %2157 = vrcp.f32 %v287_v55 }
 0x3bb   :  { %2159 = vrcp.f32 %v290_v54 }
 0x3bc   :  { %v690_v56 = vpop.xlane.xlu1 %689 }
 0x3bd   :  { %v687_v57 = vpop.xlane.xlu0 %686 }
 0x3be   :  { %2161 = vrcp.f32 %v687_v57 }
 0x3bf   :  { %v2154_v58 = vpop.eup %2153  ;;  %2163 = vrcp.f32 %v690_v56 }
 0x3c0   :  { %v2128_v59 = vpop.permute.xlu1 %2127  ;;  %v406_v60 = vmul.f32 %v2154_v58, %v2144_v39  ;;  %v2156_v26 = vpop.eup %2155 }
 0x3c1   :  { %v2123_v61 = vpop.permute.xlu0 %2122  ;;  %v2130_v62 = vunpack.i.h.bf16 %v2128_v59  ;;  %v2129_v30 = vunpack.i.l.bf16 %v2128_v59  ;;  %v407_v4 = vmul.f32 %v2156_v26, %v2142_v38  ;;  %v1048_v26 = vld [vmem:[#allocation7 + $0x68] sm:$0xff] }
 0x3c2   :  { %v2125_v63 = vunpack.i.h.bf16 %v2123_v61  ;;  %v2124_v1 = vunpack.i.l.bf16 %v2123_v61  ;;  %1931 = vmatprep.mubr.msk.f32.mxu1 %vm272_vm3, %v406_v60 }
 0x3c3   :  { %v1993_v3 = vpack.c.bf16 %v2130_v62, %v2129_v30 }
 0x3c4   :  { %v1989_v22 = vpack.c.bf16 %v2125_v63, %v2124_v1  ;;  %v2158_v2 = vpop.eup %2157  ;;  %v2133_v6 = vpop.permute.xlu1 %2132  ;;  %v983_v63 = vld [vmem:[#allocation7 + $0x9] ss:$0 sm:$0xff]  ;;  %v984_v1 = vld [vmem:[#allocation7 + $0xa] ss:$0 sm:$0xff] }
 0x3c5   :  { %v293_v5 = vmul.f32 %v2158_v2, %v2148_v43  ;;  %v2160_v7 = vpop.eup %2159  ;;  %v2135_v9 = vunpack.i.h.bf16 %v2133_v6  ;;  %v2134_v10 = vunpack.i.l.bf16 %v2133_v6  ;;  %v779_v21 = vpop.permute.xlu0 %778  ;;  %v1044_v2 = vld [vmem:[#allocation7 + $0x38] sm:$0xff]  ;;  %v1047_v6 = vld [vmem:[#allocation7 + $0x60] sm:$0xff] }
 0x3c6   :  { %1990 = vmatprep.subr.bf16.mxu1 %v1989_v22  ;;  %v294_v11 = vmul.f32 %v2160_v7, %v2146_v42 }
 0x3c7   :  { %1992 = vmatpush3.bf16.msra.mxu1 %v1989_v22  ;;  %v2007_v15 = vpack.c.bf16 %v2135_v9, %v2134_v10  ;;  %v1040_v22 = vld [vmem:[#allocation7 + $0x18] sm:$0xff]  ;;  %v1043_v9 = vld [vmem:[#allocation7 + $0x30] sm:$0xff]  ;;  %v1051_v10 = vld [vmem:[#allocation7 + $0x80] sm:$0xff] }
 0x3c8   :  { %1994 = vmatprep.subr.bf16.mxu1 %v1993_v3  ;;  %v2162_v8 = vpop.eup %2161  ;;  %v781_v23 = vpop.permute.xlu1 %780 }
 0x3c9   :  { %v693_v12 = vmul.f32 %v2162_v8, %v2152_v47  ;;  %v2164_v18 = vpop.eup %2163 }
 0x3ca   :  { %1932 = vmatmul.mubr.msk.f32.vlgmr.msra.gmra.mrb[2].mxu1 %vm272_vm3, %v407_v4  ;;  %v694_v19 = vmul.f32 %v2164_v18, %v2150_v46  ;;  %v1052_v4 = vld [vmem:[#allocation7 + $0x88] sm:$0xff]  ;;  %v1060_v18 = vld [vmem:[#allocation7 + $0xd8] sm:$0xff] }
 0x3cb   :  { %1996 = vmatpush3.bf16.msra.mxu1 %v1993_v3  ;;  %1938 = vmatprep.mubr.msk.f32.mxu1 %vm272_vm3, %v293_v5  ;;  %v2017_v3 = vpack.c.bf16 %v1048_v26, %v1040_v22  ;;  %v1039_v5 = vld [vmem:[#allocation7 + $0x10] sm:$0xff]  ;;  %v2033_v7 = vpack.c.bf16 %v1052_v4, %v1044_v2  ;;  %v1057_v4 = vld [vmem:[#allocation7 + $0xc0] sm:$0xff] }
 0x3cc   :  { %2004 = vmatprep.subr.bf16.mxu1 %v2444_v32  ;;  %v2019_v8 = vpack.c.bf16 %v1047_v6, %v1039_v5  ;;  %v1454_v22 = vld [vmem:[#allocation8 + $0x40] sm:$0xff]  ;;  %v1054_v6 = vld [vmem:[#allocation7 + $0x98] sm:$0xff] }
 0x3cd   :  { %2018 = vmatprep.subr.bf16.mxu0 %v2017_v3  ;;  %v1065_v5 = vld [vmem:[#allocation7 + $0x110] sm:$0xff] }
 0x3ce   :  { %2020 = vmatpush1.bf16.msra.mxu0 %v2019_v8  ;;  %v1463_v8 = vld [vmem:[#allocation8 + $0x88] sm:$0xff] }
 0x3d2   :  { %1939 = vmatmul.mubr.msk.f32.vlgmr.msra.gmra.mrb[2].mxu1 %vm272_vm3, %v294_v11  ;;  %v2035_v11 = vpack.c.bf16 %v1051_v10, %v1043_v9  ;;  %v1471_v9 = vld [vmem:[#allocation8 + $0xc8] sm:$0xff]  ;;  %v2031_v10 = vpack.c.bf16 %v1065_v5, %v1057_v4 }
 0x3d3   :  { %2006 = vmatpush3.bf16.msra.mxu1 %v2444_v32  ;;  %1952 = vmatprep.mubr.msk.f32.mxu1 %vm272_vm3, %v693_v12  ;;  %v1056_v12 = vld [vmem:[#allocation7 + $0xb8] sm:$0xff] }
 0x3d4   :  { %2009 = vmatprep.subr.msk.bf16.mxu1 %vm2456_vm2, %v2007_v15 }
 0x3da   :  { %1953 = vmatmul.mubr.msk.f32.vlgmr.msra.gmra.mrb[2].mxu1 %vm272_vm3, %v694_v19 }
 0x3db   :  { %1959 = vmatprep.mubr.msk.f32.mxu1 %vm188_vm1, %v779_v21  ;;  %v1068_v21 = vld [vmem:[#allocation7 + $0x128] sm:$0xff] }
 0x3dc   :  { %2012 = vmatpush3.bf16.xpose.msk.msra.mxu1 %vm2456_vm2, %v2007_v15  ;;  %v1064_v15 = vld [vmem:[#allocation7 + $0x108] sm:$0xff] }
 0x3dd   :  { %v2021_v19 = vpack.c.bf16 %v1064_v15, %v1056_v12  ;;  %v1045_v15 = vld [vmem:[#allocation7 + $0x40] sm:$0xff] }
 0x3df   :  { %2022 = vmatprep.subr.bf16.mxu0 %v2021_v19  ;;  %v2053_v19 = vpack.c.bf16 %v1471_v9, %v1463_v8 }
 0x3e3   :  { %1960 = vmatmul.mubr.msk.f32.vlgmr.msra.gmra.mrb[4].mxu1 %vm188_vm1, %v781_v23  ;;  %v1055_v23 = vld [vmem:[#allocation7 + $0xb0] sm:$0xff] }
 0x4b6   :  { %v1961_v24 = vpop.f32.mrb[4].mxu1 }
 0x4b7   :  { %v866_v32 = vadd.f32 %v1961_v24, %v2478_v50  ;;  %v860_v25 = vpop.f32.mrb[5].mxu1  ;;  %v1063_v24 = vld [vmem:[#allocation7 + $0x100] sm:$0xff] }
 0x4b8   :  { %v861_v27 = vadd.f32 %v860_v25, %v2480_v51  ;;  %v2023_v25 = vpack.c.bf16 %v1063_v24, %v1055_v23  ;;  %v1070_v23 = vld [vmem:[#allocation7 + $0x138] sm:$0xff]  ;;  %v1462_v24 = vld [vmem:[#allocation8 + $0x80] sm:$0xff] }
 0x4b9   :  { %v872_v33 = vsel %vm272_vm3, %v866_v32, -inf }
 0x4ba   :  { %873 = vmax.xlane.f32.xlu1 %v872_v33  ;;  %v869_v34 = vsel %vm272_vm3, %v861_v27, -inf  ;;  %v1067_v33 = vld [vmem:[#allocation7 + $0x120] sm:$0xff]  ;;  %2024 = vmatpush1.bf16.msra.mxu0 %v2023_v25 }
 0x4bb   :  { %870 = vmax.xlane.f32.xlu0 %v869_v34 }
 0x4cb   :  { %2137 = vrot.lane.b32.xlu1 %v2136_v31, %s2313_s17 }
 0x547   :  { %v874_v37 = vpop.xlane.xlu1 %873 }
 0x548   :  { %v876_v35 = vsub.f32 %v866_v32, %v874_v37  ;;  %v871_v36 = vpop.xlane.xlu0 %870  ;;  %v2037_v32 = vpack.c.bf16 %v1068_v21, %v1060_v18  ;;  %v1042_v37 = vld [vmem:[#allocation7 + $0x28] sm:$0xff]  ;;  %v1053_v18 = vld [vmem:[#allocation7 + $0x90] sm:$0xff] }
 0x549   :  { %v875_v38 = vsub.f32 %v861_v27, %v871_v36  ;;  %v1059_v27 = vld [vmem:[#allocation7 + $0xd0] sm:$0xff]  ;;  %v1062_v21 = vld [vmem:[#allocation7 + $0xe8] sm:$0xff]  ;;  %v2043_v25 = vpack.c.bf16 %v1053_v18, %v1045_v15 }
 0x54a   :  { %v879_v39 = vmul.f32 1.442695, %v876_v35  ;;  %v2039_v34 = vpack.c.bf16 %v1067_v33, %v1059_v27  ;;  %v1050_v35 = vld [vmem:[#allocation7 + $0x78] sm:$0xff]  ;;  %v2045_v27 = vpack.c.bf16 %v1070_v23, %v1062_v21  ;;  %v1061_v33 = vld [vmem:[#allocation7 + $0xe0] sm:$0xff] }
 0x54b   :  { %v877_v50 = vmul.f32 1.442695, %v875_v38  ;;  %v2138_v40 = vpop.permute.xlu1 %2137  ;;  %v2025_v36 = vpack.c.bf16 %v1050_v35, %v1042_v37  ;;  %v1447_v38 = vld [vmem:[#allocation8 + $0x8] sm:$0xff]  ;;  %v1449_v37 = vld [vmem:[#allocation8 + $0x18] sm:$0xff] }
 0x54c   :  { %v2140_v41 = vunpack.i.h.bf16 %v2138_v40  ;;  %v2139_v51 = vunpack.i.l.bf16 %v2138_v40  ;;  %v1457_v35 = vld [vmem:[#allocation8 + $0x58] sm:$0xff] }
 0x54d   :  { %2165 = vpow2.f32 %v877_v50  ;;  %2026 = vmatprep.subr.bf16.mxu0 %v2025_v36 }
 0x54e   :  { %v2013_v42 = vpack.c.bf16 %v2140_v41, %v2139_v51  ;;  %2167 = vpow2.f32 %v879_v39  ;;  %v1455_v39 = vld [vmem:[#allocation8 + $0x48] sm:$0xff] }
 0x54f   :  { %v2049_v50 = vpack.c.bf16 %v1455_v39, %v1447_v38  ;;  %v2057_v39 = vpack.c.bf16 %v1457_v35, %v1449_v37  ;;  %v1452_v37 = vld [vmem:[#allocation8 + $0x30] sm:$0xff] }
 0x550   :  { %2014 = vmatprep.subr.bf16.mxu1 %v2013_v42  ;;  %v1460_v35 = vld [vmem:[#allocation8 + $0x70] sm:$0xff] }
 0x551   :  { %2016 = vmatpush3.bf16.msra.mxu1 %v2013_v42 }
 0x552   :  { %2034 = vmatprep.subr.bf16.mxu1 %v2033_v7 }
 0x557   :  { %v2166_v43 = vpop.eup %2165 }
 0x558   :  { %v881_v44 = vsel %vm272_vm3, %v2166_v43, 0.0  ;;  %v2168_v45 = vpop.eup %2167 }
 0x559   :  { %882 = vadd.xlane.f32.xlu0 %v881_v44  ;;  %v884_v28 = vsel %vm272_vm3, %v2168_v45, 0.0 }
 0x55d   :  { %885 = vadd.xlane.f32.xlu0 %v884_v28 }
 0x573   :  { %989 = vrot.lane.b32.xlu0 %v982_v29, %s2308_s1 }
 0x5e6   :  { %v883_v31 = vpop.xlane.xlu0 %882 }
 0x5e7   :  { %2169 = vrcp.f32 %v883_v31 }
 0x5ea   :  { %v886_v46 = vpop.xlane.xlu0 %885 }
 0x5eb   :  { %2171 = vrcp.f32 %v886_v46 }
 0x5ee   :  { %v990_v53 = vpop.permute.xlu0 %989 }
 0x5f1   :  { %v2170_v47 = vpop.eup %2169 }
 0x5f2   :  { %v889_v48 = vmul.f32 %v2170_v47, %v2166_v43 }
 0x5f4   :  { %1966 = vmatprep.mubr.msk.f32.mxu1 %vm272_vm3, %v889_v48 }
 0x5f5   :  { %v2172_v49 = vpop.eup %2171 }
 0x5f6   :  { %v890_v52 = vmul.f32 %v2172_v49, %v2168_v45 }
 0x5f8   :  { %1967 = vmatmul.mubr.msk.f32.vlgmr.msra.gmra.mrb[2].mxu1 %vm272_vm3, %v890_v52 }
 0x5f9   :  { %1340 = vmatprep.mubr.f32.mxu1 %v2309_v0  ;;  %2036 = vmatpush1.bf16.msra.mxu1 %v2035_v11 }
 0x5fa   :  { %2038 = vmatprep.subr.bf16.mxu1 %v2037_v32  ;;  %v1470_v32 = vld [vmem:[#allocation8 + $0xc0] sm:$0xff] }
 0x5fb   :  { %v2055_v36 = vpack.c.bf16 %v1470_v32, %v1462_v24  ;;  %v1466_v24 = vld [vmem:[#allocation8 + $0xa0] sm:$0xff]  ;;  %v1094_v32 = vsub.s32 4, %v2416_v16 }
 0x5fd   :  { %2040 = vmatpush1.bf16.msra.mxu1 %v2039_v34  ;;  %v1069_v34 = vld [vmem:[#allocation7 + $0x130] sm:$0xff] }
 0x5fe   :  { %2050 = vmatprep.subr.bf16.mxu1 %v2049_v50  ;;  %v2047_v38 = vpack.c.bf16 %v1069_v34, %v1061_v33  ;;  %v1448_v50 = vld [vmem:[#allocation8 + $0x10] sm:$0xff]  ;;  %v1474_v34 = vld [vmem:[#allocation8 + $0xe0] sm:$0xff] }
 0x6cb   :  { %v1968_v54 = vpop.f32.mrb[2].mxu1 }
 0x6cc   :  { %v993_v55 = vadd.f32 %v1968_v54, %v990_v53  ;;  %v971_v56 = vpop.f32.mrb[3].mxu1 }
 0x6cd   :  { %v992_v57 = vadd.f32 %v990_v53, %v971_v56 }
 0x6ce   :  { %v2535_v58 = vadd.f32 %v993_v55, %v2412_v14 }
 0x6cf   :  { %v2538_v59 = vadd.f32 %v992_v57, %v2407_v13 }
 0x6d0   :  { %v999_v60 = vsel %vm98_vm0, %v2535_v58, 0.0  ;;  %v1006_v30 = vmul.f32 %v2535_v58, %v2535_v58 }
 0x6d1   :  { %1000 = vadd.xlane.f32.xlu1 %v999_v60  ;;  %v1005_v61 = vmul.f32 %v2538_v59, %v2538_v59  ;;  %v996_v14 = vsel %vm98_vm0, %v2538_v59, 0.0  ;;  %v1041_v60 = vld [vmem:[#allocation7 + $0x20] sm:$0xff] }
 0x6d2   :  { %v1010_v13 = vsel %vm98_vm0, %v1006_v30, 0.0 }
 0x6d3   :  { %v1007_v62 = vsel %vm98_vm0, %v1005_v61, 0.0  ;;  %v1049_v61 = vld [vmem:[#allocation7 + $0x70] sm:$0xff] }
 0x6d4   :  { %1008 = vadd.xlane.f32.xlu0 %v1007_v62  ;;  %v2027_v26 = vpack.c.bf16 %v1049_v61, %v1041_v60 }
 0x6d5   :  { %997 = vadd.xlane.f32.xlu1 %v996_v14  ;;  %v1058_v14 = vld [vmem:[#allocation7 + $0xc8] sm:$0xff] }
 0x6d8   :  { %1011 = vadd.xlane.f32.xlu0 %v1010_v13  ;;  %v1066_v13 = vld [vmem:[#allocation7 + $0x118] sm:$0xff] }
 0x6e6   :  { %1028 = vrot.lane.b32.xlu1 %v983_v63, %s2308_s1 }
 0x6ee   :  { %1034 = vrot.lane.b32.xlu0 %v984_v1, %s2308_s1  ;;  %v1446_v1 = vld [vmem:[#allocation8] sm:$0xff] }
 0x6ef   :  { %v2051_v7 = vpack.c.bf16 %v1454_v22, %v1446_v1  ;;  %v1086_v1 = vsub.s32 2, %v2416_v16 }
 0x75e   :  { %v1001_v40 = vpop.xlane.xlu1 %1000 }
 0x75f   :  { %v1004_v51 = vmul.f32 0.03125, %v1001_v40  ;;  %v1456_v40 = vld [vmem:[#allocation8 + $0x50] sm:$0xff] }
 0x761   :  { %v1009_v41 = vpop.xlane.xlu0 %1008  ;;  %v1016_v29 = vmul.f32 %v1004_v51, %v1004_v51  ;;  %v1020_v54 = vsub.f32 %v2535_v58, %v1004_v51  ;;  %v1046_v58 = vld [vmem:[#allocation7 + $0x48] sm:$0xff] }
 0x762   :  { %v998_v42 = vpop.xlane.xlu1 %997  ;;  %v1013_v44 = vmul.f32 0.03125, %v1009_v41  ;;  %v2041_v12 = vpack.c.bf16 %v1054_v6, %v1046_v58  ;;  %v2059_v41 = vpack.c.bf16 %v1456_v40, %v1448_v50  ;;  %v1465_v51 = vld [vmem:[#allocation8 + $0x98] sm:$0xff] }
 0x763   :  { %v1003_v43 = vmul.f32 0.03125, %v998_v42  ;;  %v1473_v42 = vld [vmem:[#allocation8 + $0xd8] sm:$0xff] }
 0x764   :  { %v1469_v50 = vld [vmem:[#allocation8 + $0xb8] sm:$0xff] }
 0x765   :  { %v1015_v45 = vmul.f32 %v1003_v43, %v1003_v43  ;;  %v1012_v28 = vpop.xlane.xlu0 %1011  ;;  %v1019_v52 = vsub.f32 %v2538_v59, %v1003_v43  ;;  %v2029_v59 = vpack.c.bf16 %v1066_v13, %v1058_v14  ;;  %v1451_v43 = vld [vmem:[#allocation8 + $0x28] sm:$0xff]  ;;  %v1450_v13 = vld [vmem:[#allocation8 + $0x20] sm:$0xff]  ;;  %v1477_v40 = vld [vmem:[#allocation8 + $0xf8] sm:$0xff] }
 0x766   :  { %v1014_v31 = vmul.f32 0.03125, %v1012_v28  ;;  %v1029_v55 = vpop.permute.xlu1 %1028  ;;  %v1464_v28 = vld [vmem:[#allocation8 + $0x90] sm:$0xff] }
 0x767   :  { %v1017_v46 = vsub.f32 %v1013_v44, %v1015_v45  ;;  %v2061_v44 = vpack.c.bf16 %v1473_v42, %v1465_v51  ;;  %v1459_v45 = vld [vmem:[#allocation8 + $0x68] sm:$0xff]  ;;  %v2071_v42 = vpack.c.bf16 %v1474_v34, %v1466_v24 }
 0x768   :  { %v1018_v47 = vsub.f32 %v1014_v31, %v1016_v29  ;;  %v1472_v29 = vld [vmem:[#allocation8 + $0xd0] sm:$0xff]  ;;  %v2065_v31 = vpack.c.bf16 %v1459_v45, %v1451_v43  ;;  %v2075_v43 = vpack.c.bf16 %v1460_v35, %v1452_v37 }
 0x769   :  { %v1021_v48 = vadd.f32 1e-05, %v1017_v46  ;;  %v1035_v30 = vpop.permute.xlu0 %1034  ;;  %v2063_v46 = vpack.c.bf16 %v1472_v29, %v1464_v28 }
 0x76a   :  { %v1022_v49 = vadd.f32 1e-05, %v1018_v47  ;;  %v1453_v47 = vld [vmem:[#allocation8 + $0x38] sm:$0xff] }
 0x76b   :  { %2173 = vrsqrt.f32 %v1021_v48  ;;  %v1461_v48 = vld [vmem:[#allocation8 + $0x78] sm:$0xff] }
 0x76c   :  { %2175 = vrsqrt.f32 %v1022_v49  ;;  %v987_v49 = vld [vmem:[#allocation7 + $0xd] ss:$0 sm:$0xff] }
 0x76d   :  { %1479 = vrot.lane.b32.xlu1 %v987_v49, %s2308_s1 }
 0x775   :  { %v2174_v53 = vpop.eup %2173 }
 0x776   :  { %v2176_v56 = vpop.eup %2175  ;;  %v1025_v57 = vmul.f32 %v2174_v53, %v1019_v52  ;;  %v1072_v52 = vld [vmem:[#allocation7 + $0x150] ss:$8 sm:$0xf] }
 0x777   :  { %v1026_v62 = vmul.f32 %v2176_v56, %v1020_v54  ;;  %v1073_v53 = vld [vmem:[#allocation7 + $0x150] ss:$8 sm:$0xf0] }
 0x778   :  { %v1031_v63 = vmul.f32 %v1029_v55, %v1025_v57  ;;  %v2581_v54 = vor.u32 %v1073_v53, %v1072_v52  ;;  %v1098_v57 = vsub.s32 5, %v2416_v16  ;;  %v1102_v53 = vsub.s32 6, %v2416_v16 }
 0x779   :  { %v1032_v2 = vmul.f32 %v1029_v55, %v1026_v62 }
 0x77a   :  { %v2554_v3 = vadd.f32 %v1035_v30, %v1031_v63  ;;  %v1079_v55 = vrot.slane %v2581_v54, %v90_v17  ;;  %v1083_v56 = vrot.slane %v2581_v54, %v94_v20  ;;  %v1458_v63 = vld [vmem:[#allocation8 + $0x60] sm:$0xff]  ;;  %v1090_v17 = vsub.s32 3, %v2416_v16  ;;  %v1475_v20 = vld [vmem:[#allocation8 + $0xe8] sm:$0xff] }
 0x77b   :  { %v2561_v11 = vadd.f32 %v1035_v30, %v1032_v2  ;;  %v1467_v2 = vld [vmem:[#allocation8 + $0xa8] sm:$0xff]  ;;  %v2067_v58 = vpack.c.bf16 %v1458_v63, %v1450_v13 }
 0x77c   :  { %1873 = vmatmul.mubr.msk.f32.vlgmr.msra.gmra.mrb[8].mxu0 %vm98_vm0, %v2554_v3  ;;  %1877 = vmatmul.mubr.msk.f32.vlgmr.msra.gmra.mrb[6].mxu1 %vm98_vm0, %v2554_v3 }
 0x77d   :  { %2028 = vmatpush1.bf16.msra.mxu0 %v2027_v26  ;;  %1192 = vmatprep.mubr.f32.mxu0 %v2309_v0  ;;  %v2594_v26 = vrot.slane %v2581_v54, %v1098_v57  ;;  %v1476_v57 = vld [vmem:[#allocation8 + $0xf0] sm:$0xff] }
 0x77e   :  { %1346 = vmatprep.mubr.f32.mxu1 %v2309_v0  ;;  %2030 = vmatprep.subr.bf16.mxu0 %v2029_v59 }
 0x77f   :  { %2052 = vmatpush1.bf16.xpose.msra.mxu1 %v2051_v7 }
 0x780   :  { %1874 = vmatmul.mubr.msk.f32.gmra.mrb[10].mxu0 %vm98_vm0, %v2561_v11  ;;  %1878 = vmatmul.mubr.msk.f32.gmra.mrb[8].mxu1 %vm98_vm0, %v2561_v11 }
 0x781   :  { %2032 = vmatpush1.bf16.msra.mxu0 %v2031_v10  ;;  %1263 = vmatprep.mubr.f32.mxu0 %v2309_v0  ;;  %v1087_v10 = vrot.slane %v2581_v54, %v1086_v1 }
 0x782   :  { %2042 = vmatprep.subr.bf16.mxu0 %v2041_v12  ;;  %2054 = vmatprep.subr.bf16.mxu1 %v2053_v19  ;;  %v2069_v12 = vpack.c.bf16 %v1475_v20, %v1467_v2  ;;  %v1091_v19 = vrot.slane %v2581_v54, %v1090_v17 }
 0x784   :  { %1875 = vmatmul.mubr.msk.f32.vlgmr.msra.gmra.mrb[12].mxu0 %vm98_vm0, %v2554_v3 }
 0x785   :  { %2044 = vmatpush1.bf16.msra.mxu0 %v2043_v25  ;;  %1269 = vmatprep.mubr.f32.mxu0 %v2309_v0 }
 0x786   :  { %2046 = vmatprep.subr.bf16.mxu0 %v2045_v27 }
 0x787   :  { %2056 = vmatpush1.bf16.xpose.msra.mxu1 %v2055_v36 }
 0x788   :  { %1876 = vmatmul.mubr.msk.f32.gmra.mrb[14].mxu0 %vm98_vm0, %v2561_v11  ;;  %2066 = vmatprep.subr.bf16.mxu1 %v2065_v31  ;;  %v2077_v31 = vpack.c.bf16 %v1477_v40, %v1469_v50 }
 0x789   :  { %2048 = vmatpush1.bf16.msra.mxu0 %v2047_v38  ;;  %1417 = vmatprep.mubr.f32.mxu0 %v2309_v0 }
 0x78a   :  { %2058 = vmatprep.subr.bf16.mxu0 %v2057_v39  ;;  %v1106_v39 = vsub.s32 7, %v2416_v16 }
 0x78c   :  { %1879 = vmatmul.mubr.msk.f32.vlgmr.msra.gmra.mrb[16].mxu0 %vm98_vm0, %v2554_v3 }
 0x78d   :  { %1423 = vmatprep.mubr.f32.mxu0 %v2309_v0  ;;  %v2073_v0 = vpack.c.bf16 %v1461_v48, %v1453_v47  ;;  %v1107_v47 = vrot.slane %v2581_v54, %v1106_v39 }
 0x790   :  { %1880 = vmatmul.mubr.msk.f32.gmra.mrb[18].mxu0 %vm98_vm0, %v2561_v11 }
 0x792   :  { %2060 = vmatpush1.bf16.xpose.msra.mxu0 %v2059_v41 }
 0x793   :  { %2062 = vmatprep.subr.bf16.mxu0 %v2061_v44  ;;  %v1095_v44 = vrot.slane %v2581_v54, %v1094_v32 }
 0x79a   :  { %2064 = vmatpush1.bf16.xpose.msra.mxu0 %v2063_v46 }
 0x79b   :  { %2074 = vmatprep.subr.bf16.mxu0 %v2073_v0 }
 0x84f   :  { %v1188_v60 = vpop.f32.mrb[8].mxu0  ;;  %v2590_v61 = vpop.f32.mrb[6].mxu1 }
 0x850   :  { %v1189_v62 = vadd.f32 %v1188_v60, %v1079_v55  ;;  %v1190_v30 = vpop.f32.mrb[9].mxu0  ;;  %v1344_v14 = vpop.f32.mrb[7].mxu1  ;;  %v1343_v49 = vadd.f32 %v2590_v61, %v1095_v44  ;;  %v1103_v61 = vrot.slane %v2581_v54, %v1102_v53 }
 0x851   :  { %v1191_v22 = vadd.f32 %v1190_v30, %v1083_v56  ;;  %v1345_v15 = vadd.f32 %v1344_v14, %v2594_v26  ;;  %v1480_v54 = vpop.permute.xlu1 %1479 }
 0x852   :  { %v1430_v6 = vmax.f32 %v1189_v62, 0.0  ;;  %v1434_v63 = vmax.f32 %v1343_v49, 0.0 }
 0x853   :  { %v1431_v59 = vmax.f32 %v1191_v22, 0.0  ;;  %v1194_v4 = vpop.f32.mrb[10].mxu0  ;;  %v2597_v5 = vpop.f32.mrb[8].mxu1  ;;  %v1435_v36 = vmax.f32 %v1345_v15, 0.0 }
 0x854   :  { %v1195_v7 = vadd.f32 %v1194_v4, %v1079_v55  ;;  %v1196_v8 = vpop.f32.mrb[11].mxu0  ;;  %v1350_v9 = vpop.f32.mrb[9].mxu1  ;;  %v1349_v1 = vadd.f32 %v2597_v5, %v1095_v44 }
 0x855   :  { %v1197_v18 = vadd.f32 %v1196_v8, %v1083_v56  ;;  %1546 = vmatprep.mubr.f32.mxu1 %v1431_v59  ;;  %v1468_v56 = vld [vmem:[#allocation8 + $0xb0] sm:$0xff]  ;;  %v1351_v60 = vadd.f32 %v1350_v9, %v2594_v26 }
 0x856   :  { %1547 = vmatmul.mubr.f32.vlgmr.msra.gmra.mrb[10].mxu1 %v1430_v6  ;;  %v1438_v25 = vmax.f32 %v1195_v7, 0.0  ;;  %v2079_v13 = vpack.c.bf16 %v1476_v57, %v1468_v56  ;;  %v1442_v16 = vmax.f32 %v1349_v1, 0.0 }
 0x857   :  { %v1439_v21 = vmax.f32 %v1197_v18, 0.0  ;;  %2068 = vmatpush1.bf16.xpose.msra.mxu1 %v2067_v58  ;;  %v1265_v23 = vpop.f32.mrb[12].mxu0  ;;  %v1443_v17 = vmax.f32 %v1351_v60, 0.0 }
 0x858   :  { %v1266_v27 = vadd.f32 %v1265_v23, %v1087_v10  ;;  %v1267_v33 = vpop.f32.mrb[13].mxu0  ;;  %2070 = vmatprep.subr.bf16.mxu1 %v2069_v12 }
 0x859   :  { %v1268_v38 = vadd.f32 %v1267_v33, %v1091_v19  ;;  %1551 = vmatprep.mubr.f32.mxu1 %v1439_v21 }
 0x85a   :  { %1552 = vmatmul.mubr.f32.gmra.mrb[12].mxu1 %v1438_v25  ;;  %v1432_v45 = vmax.f32 %v1266_v27, 0.0 }
 0x85b   :  { %v1433_v41 = vmax.f32 %v1268_v38, 0.0  ;;  %v1271_v51 = vpop.f32.mrb[14].mxu0  ;;  %1696 = vmatprep.mubr.f32.mxu1 %v1435_v36 }
 0x85c   :  { %v1272_v28 = vadd.f32 %v1271_v51, %v1087_v10  ;;  %v1273_v29 = vpop.f32.mrb[15].mxu0 }
 0x85d   :  { %v1274_v46 = vadd.f32 %v1273_v29, %v1091_v19  ;;  %1621 = vmatprep.mubr.f32.mxu0 %v1433_v41  ;;  %v985_v29 = vld [vmem:[#allocation7 + $0xb] ss:$0 sm:$0xff] }
 0x85e   :  { %1622 = vmatmul.mubr.f32.vlgmr.msra.gmra.mrb[20].mxu0 %v1432_v45  ;;  %v1440_v52 = vmax.f32 %v1272_v28, 0.0 }
 0x85f   :  { %v1441_v48 = vmax.f32 %v1274_v46, 0.0  ;;  %2072 = vmatpush1.bf16.xpose.msra.mxu1 %v2071_v42  ;;  %2076 = vmatpush1.bf16.xpose.msra.mxu0 %v2075_v43  ;;  %v1419_v0 = vpop.f32.mrb[16].mxu0 }
 0x860   :  { %v1421_v55 = vpop.f32.mrb[17].mxu0  ;;  %2078 = vmatprep.subr.bf16.mxu0 %v2077_v31  ;;  %v1420_v2 = vadd.f32 %v1419_v0, %v1103_v61 }
 0x861   :  { %v1422_v62 = vadd.f32 %v1421_v55, %v1107_v47  ;;  %1626 = vmatprep.mubr.f32.mxu0 %v1441_v48 }
 0x862   :  { %1627 = vmatmul.mubr.f32.gmra.mrb[22].mxu0 %v1440_v52  ;;  %v1436_v20 = vmax.f32 %v1420_v2, 0.0 }
 0x863   :  { %v1437_v30 = vmax.f32 %v1422_v62, 0.0  ;;  %v1425_v14 = vpop.f32.mrb[18].mxu0 }
 0x864   :  { %v1427_v22 = vpop.f32.mrb[19].mxu0  ;;  %v1426_v59 = vadd.f32 %v1425_v14, %v1103_v61 }
 0x865   :  { %1771 = vmatprep.mubr.f32.mxu0 %v1437_v30  ;;  %v1428_v26 = vadd.f32 %v1427_v22, %v1107_v47 }
 0x866   :  { %1697 = vmatmul.mubr.f32.vlgmr.msra.gmra.mrb[14].mxu1 %v1434_v63  ;;  %v1444_v58 = vmax.f32 %v1426_v59, 0.0 }
 0x867   :  { %1701 = vmatprep.mubr.f32.mxu1 %v1443_v17  ;;  %2080 = vmatpush1.bf16.xpose.msra.mxu0 %v2079_v13  ;;  %v1445_v4 = vmax.f32 %v1428_v26, 0.0 }
 0x86a   :  { %1702 = vmatmul.mubr.f32.gmra.mrb[16].mxu1 %v1442_v16 }
 0x86e   :  { %1772 = vmatmul.mubr.f32.vlgmr.msra.gmra.mrb[24].mxu0 %v1436_v20 }
 0x86f   :  { %1776 = vmatprep.mubr.f32.mxu0 %v1445_v4 }
 0x872   :  { %1777 = vmatmul.mubr.f32.gmra.mrb[26].mxu0 %v1444_v58 }
 0x929   :  { %v1548_v5 = vpop.f32.mrb[10].mxu1 }
 0x92a   :  { %v1550_v6 = vpop.f32.mrb[11].mxu1  ;;  %v1549_v9 = vadd.f32 %v1548_v5, %v1480_v54 }
 0x92d   :  { %v1553_v7 = vpop.f32.mrb[12].mxu1 }
 0x92e   :  { %v1555_v8 = vpop.f32.mrb[13].mxu1  ;;  %v1554_v18 = vadd.f32 %v1553_v7, %v1480_v54 }
 0x931   :  { %v1623_v10 = vpop.f32.mrb[20].mxu0 }
 0x932   :  { %v1624_v12 = vadd.f32 %v1623_v10, %v1549_v9  ;;  %v1625_v15 = vpop.f32.mrb[21].mxu0 }
 0x935   :  { %v1628_v19 = vpop.f32.mrb[22].mxu0 }
 0x936   :  { %v1629_v21 = vadd.f32 %v1628_v19, %v1554_v18  ;;  %v1630_v23 = vpop.f32.mrb[23].mxu0 }
 0x939   :  { %v1698_v24 = vpop.f32.mrb[14].mxu1 }
 0x93a   :  { %v1699_v32 = vadd.f32 %v1698_v24, %v1624_v12  ;;  %v1700_v25 = vpop.f32.mrb[15].mxu1 }
 0x93d   :  { %v1703_v27 = vpop.f32.mrb[16].mxu1 }
 0x93e   :  { %v1704_v33 = vadd.f32 %v1703_v27, %v1629_v21  ;;  %v1705_v34 = vpop.f32.mrb[17].mxu1 }
 0x941   :  { %v1773_v37 = vpop.f32.mrb[24].mxu0 }
 0x942   :  { %v1774_v35 = vadd.f32 %v1773_v37, %v1699_v32  ;;  %v1775_v36 = vpop.f32.mrb[25].mxu0 }
 0x944   :  { %v1782_v38 = vadd.f32 %v1774_v35, %v2554_v3  ;;  %v986_v3 = vld [vmem:[#allocation7 + $0xc] ss:$0 sm:$0xff] }
 0x945   :  { %v1778_v39 = vpop.f32.mrb[26].mxu0 }
 0x946   :  { %v1779_v50 = vadd.f32 %v1778_v39, %v1704_v33  ;;  %v1780_v40 = vpop.f32.mrb[27].mxu0  ;;  %v1784_v41 = vsel %vm98_vm0, %v1782_v38, 0.0  ;;  %v1792_v44 = vmul.f32 %v1782_v38, %v1782_v38 }
 0x947   :  { %1785 = vadd.xlane.f32.xlu1 %v1784_v41 }
 0x948   :  { %v1783_v51 = vadd.f32 %v1779_v50, %v2561_v11  ;;  %v1794_v28 = vsel %vm98_vm0, %v1792_v44, 0.0 }
 0x94a   :  { %v1787_v42 = vsel %vm98_vm0, %v1783_v51, 0.0  ;;  %v1793_v43 = vmul.f32 %v1783_v51, %v1783_v51 }
 0x94b   :  { %1788 = vadd.xlane.f32.xlu0 %v1787_v42 }
 0x94c   :  { %v1797_v45 = vsel %vm98_vm0, %v1793_v43, 0.0 }
 0x94d   :  { %1798 = vadd.xlane.f32.xlu1 %v1797_v45 }
 0x94f   :  { %1795 = vadd.xlane.f32.xlu0 %v1794_v28 }
 0x95e   :  { %1821 = vrot.lane.b32.xlu1 %v986_v3, %s2308_s1 }
 0x965   :  { %1815 = vrot.lane.b32.xlu0 %v985_v29, %s2308_s1 }
 0x9d4   :  { %v1786_v31 = vpop.xlane.xlu1 %1785 }
 0x9d5   :  { %v1790_v11 = vmul.f32 0.03125, %v1786_v31 }
 0x9d7   :  { %v1802_v53 = vmul.f32 %v1790_v11, %v1790_v11  ;;  %v1806_v63 = vsub.f32 %v1782_v38, %v1790_v11 }
 0x9d8   :  { %v1789_v46 = vpop.xlane.xlu0 %1788 }
 0x9d9   :  { %v1791_v47 = vmul.f32 0.03125, %v1789_v46 }
 0x9da   :  { %v1799_v48 = vpop.xlane.xlu1 %1798 }
 0x9db   :  { %v1803_v0 = vmul.f32 %v1791_v47, %v1791_v47  ;;  %v1801_v49 = vmul.f32 0.03125, %v1799_v48  ;;  %v1807_v30 = vsub.f32 %v1783_v51, %v1791_v47 }
 0x9dc   :  { %v1796_v52 = vpop.xlane.xlu0 %1795 }
 0x9dd   :  { %v1805_v55 = vsub.f32 %v1801_v49, %v1803_v0  ;;  %v1800_v56 = vmul.f32 0.03125, %v1796_v52 }
 0x9de   :  { %v1822_v22 = vpop.permute.xlu1 %1821 }
 0x9df   :  { %v1809_v57 = vadd.f32 1e-05, %v1805_v55  ;;  %v1804_v60 = vsub.f32 %v1800_v56, %v1802_v53 }
 0x9e0   :  { %v1816_v13 = vpop.permute.xlu0 %1815 }
 0x9e1   :  { %2177 = vrsqrt.f32 %v1809_v57  ;;  %v1808_v62 = vadd.f32 1e-05, %v1804_v60 }
 0x9e3   :  { %2179 = vrsqrt.f32 %v1808_v62 }
 0x9eb   :  { %v2178_v14 = vpop.eup %2177 }
 0x9ec   :  { %v1813_v1 = vmul.f32 %v2178_v14, %v1807_v30 }
 0x9ed   :  { %v2180_v61 = vpop.eup %2179 }
 0x9ee   :  { %v1812_v17 = vmul.f32 %v2180_v61, %v1806_v63  ;;  %v1819_v16 = vmul.f32 %v1816_v13, %v1813_v1 }
 0x9f0   :  { %v1818_v2 = vmul.f32 %v1816_v13, %v1812_v17  ;;  %v1825_v26 = vadd.f32 %v1822_v22, %v1819_v16 }
 0x9f2   :  { %v1824_v20 = vadd.f32 %v1822_v22, %v1818_v2  ;;  %1827 = vst.msk [vmem:[#allocation10 + $0x8] sm:$0xff] %vm98_vm0, %v1825_v26 }
 0x9f4   :  { %1826 = vst.msk [vmem:[#allocation10] sm:$0xff] %vm98_vm0, %v1824_v20 }
 0x9f5   :  { %2280 = shalt.err (!%p2277_p8)
}
 0x9f6   :  { %s2281_s25 = scalar_lea.hbm %s2640_s4, 256 }
 0x9f7   :  { %p2282_p9 = scmp.ne.s32.totalorder %s2640_s4, %s2281_s25  ;;  %p2285_p10 = scmp.lt.u32.totalorder %s2281_s25, %s2640_s4 }
 0x9f9   :  { %p2287_p11 = pnand %p2285_p10, %p2282_p9 }
 0x9fb   :  { %2290 = shalt.err (!%p2287_p11)
}
 0x9fc   :  { %1839 = dma.vmem_to_hbm [thread:$0]  %s1834_s23, 256, %s2640_s4, [#allocation4], %s2301_s27, %s2301_s27, %s2302_s28  }
 0x9fd   :  { %2297 = dma.done.wait [#allocation4], 256  }
 0x9fe   :  { %2298 = vsyncadd [#allocation4], 4294967040 }
 0x9ff   :  { %1843 = vsyncpa [#allocation3], 1 }
 0xa00   :  { %1844 = vsyncpa [#allocation6], 1 }
 0xa01   :  { %1845 = vsyncpa [#allocation9], 1 }
 0xa02   :  { %1846 = vsyncpa [#allocation4], 1 }

</bundles_post_ra>
